<compile_context>
chip_gen: v7x
topology: tpu7x:2x2x1
jax: 0.10.0
libtpu: 0.0.40
codegen_flags: <defaults>
</compile_context>

<pallas_src>
import functools

import jax
import jax.numpy as jnp
from jax.experimental import pallas as pl
from jax.experimental.pallas import tpu as pltpu


# ----------------------------- Pallas kernel -------------------------------

def art_head_kernel(p_ref, wbd_ref, bc_ref, wl_ref, g_ref, beta_ref, o_ref,
                    *, eps):
    """Fused conv-as-matmul + bias + ReLU -> Linear -> BatchNorm1d -> sigmoid.

    p_ref   : (B, P*K)    bf16 im2col patches, row-major (p=(oh,ow), k=(c,kh,kw))
    wbd_ref : (P*K, F)    bf16 block-diagonal conv weight, F = P*OC, (p, oc) order
    bc_ref  : (1, F)      f32 conv bias tiled over positions, (p, oc) order
    wl_ref  : (F, Npad)   bf16 linear weight, rows permuted to (p, oc) order,
                          columns zero-padded to a lane-dense Npad (>=128)
    g_ref   : (1, Npad)   f32 scaling * BN gamma (zero in padded columns)
    beta_ref: (1, Npad)   f32 scaling * BN beta  (zero in padded columns)
    o_ref   : (B, Npad)   f32
    """
    # Conv (im2col matmul, bf16 MXU, f32 accumulate) + bias + ReLU.  Because
    # the conv weight is block-diagonal over positions, the result IS the
    # flattened feature map (B, F): lane-dense in VMEM, no HBM round trip.
    feat = jnp.dot(p_ref[...], wbd_ref[...],
                   preferred_element_type=jnp.float32) + bc_ref[...]
    feat = jnp.maximum(feat, 0.0)   # the module's second ReLU is idempotent

    # Linear layer (Flatten permutation folded into wl_ref; linear bias
    # omitted because it cancels under train-mode BatchNorm).
    y = jnp.dot(feat, wl_ref[...].astype(jnp.float32),
                preferred_element_type=jnp.float32)

    # BatchNorm1d, training-mode batch statistics (biased variance).  Valid
    # because the whole batch lives in this single block.
    mean = jnp.mean(y, axis=0, keepdims=True)
    var = jnp.mean(jnp.square(y - mean), axis=0, keepdims=True)
    z = g_ref[...] * ((y - mean) * jax.lax.rsqrt(var + eps)) + beta_ref[...]

    # ScalingSigmoid (scaling already folded into g_ref / beta_ref).
    o_ref[...] = jax.nn.sigmoid(z)


# --------------------------- parameter folding -----------------------------

def conv_out_hw(h, w, kernel_size, stride, padding):
    oh = (h + 2 * padding - kernel_size) // stride + 1
    ow = (w + 2 * padding - kernel_size) // stride + 1
    return oh, ow


def prepare_params(params, *, image_shape, kernel_size=3, stride=2, padding=1,
                   sigmoid_scaling=1.0, weight_dtype=jnp.bfloat16):
    """One-time folding of raw (torch-layout) parameters into kernel layout."""
    c, h, w = image_shape
    wc, bc = params["conv_w"], params["conv_b"]      # (OC, C, KH, KW), (OC,)
    wl = params["lin_w"]                             # (N, F_torch)
    # params["lin_b"] is intentionally unused: it cancels under train-mode BN.
    gamma, beta = params["bn_g"], params["bn_b"]     # (N,), (N,)

    oc = wc.shape[0]
    oh, ow = conv_out_hw(h, w, kernel_size, stride, padding)
    p = oh * ow
    k = c * kernel_size * kernel_size
    n = wl.shape[0]
    f = p * oc
    n_pad = max(128, ((n + 127) // 128) * 128)       # lane-dense output width

    # Conv weight as (K, OC), k ordered (c, kh, kw) like torch's flattening.
    w_mat = wc.reshape(oc, k).T.astype(jnp.float32)

    # Block-diagonal conv weight: patches (B, P*K) @ (P*K, P*OC) produces the
    # flattened feature map directly (Flatten folded into the conv matmul).
    w4 = jnp.zeros((p, k, p, oc), jnp.float32)
    diag = jnp.arange(p)
    w4 = w4.at[diag, :, diag, :].set(jnp.broadcast_to(w_mat, (p, k, oc)))
    conv_w_bd = w4.reshape(p * k, f).astype(weight_dtype)

    conv_b_tiled = jnp.tile(bc.astype(jnp.float32), p).reshape(1, f)  # (p, oc)

    # Linear weight with rows permuted from torch's (oc, oh, ow) flatten order
    # to our (oh, ow, oc) order -> no activation transpose needed anywhere.
    # Columns zero-padded to n_pad for a lane-dense output store.
    lin_w_perm = (wl.astype(jnp.float32)
                  .reshape(n, oc, oh, ow)
                  .transpose(2, 3, 1, 0)             # (oh, ow, oc, n)
                  .reshape(f, n))
    lin_w_pad = jnp.zeros((f, n_pad), jnp.float32).at[:, :n].set(lin_w_perm)
    lin_w_pad = lin_w_pad.astype(weight_dtype)

    # ScalingSigmoid's scaling folded into the BN affine parameters.
    g_pad = jnp.zeros((1, n_pad), jnp.float32).at[0, :n].set(
        sigmoid_scaling * gamma.astype(jnp.float32))
    b_pad = jnp.zeros((1, n_pad), jnp.float32).at[0, :n].set(
        sigmoid_scaling * beta.astype(jnp.float32))

    return dict(conv_w_bd=conv_w_bd, conv_b=conv_b_tiled, lin_w=lin_w_pad,
                bn_g=g_pad, bn_b=b_pad)


# ------------------------------ forward pass --------------------------------

@functools.partial(
    jax.jit,
    static_argnames=("output_size", "kernel_size", "stride", "padding"))
def art_head_forward(x, prep, *, output_size, kernel_size=3, stride=2,
                     padding=1):
    """x: (B, C, H, W) float32 (NCHW).  prep: output of prepare_params."""
    b, _, h, w = x.shape
    oh, ow = conv_out_hw(h, w, kernel_size, stride, padding)
    pk = prep["conv_w_bd"].shape[0]          # P * K
    n_pad = prep["lin_w"].shape[1]

    # im2col (light XLA glue, fused under jit): rows are batches, columns are
    # (oh, ow, c, kh, kw) row-major so each position p occupies a contiguous
    # K-chunk matching the block-diagonal conv weight.  Emitted in bf16.
    # TODO(synk): for large B, gather patches in-kernel instead of writing
    # them to HBM here (patches are 2.25x the bytes of x).
    xp = jnp.pad(x, ((0, 0), (0, 0), (padding, padding), (padding, padding)))
    cols = []
    for kh in range(kernel_size):
        for kw in range(kernel_size):
            cols.append(xp[:, :, kh:kh + stride * oh:stride,
                              kw:kw + stride * ow:stride])    # (B, C, OH, OW)
    patches = jnp.stack(cols, axis=-1)                        # (B, C, OH, OW, KH*KW)
    patches = patches.transpose(0, 2, 3, 1, 4).reshape(b, pk)  # (B, P*K)
    patches = patches.astype(prep["conv_w_bd"].dtype)

    kernel = functools.partial(art_head_kernel, eps=1e-5)
    out = pl.pallas_call(
        kernel,
        out_shape=jax.ShapeDtypeStruct((b, n_pad), jnp.float32),
        in_specs=[pl.BlockSpec(memory_space=pltpu.MemorySpace.VMEM)] * 6,
        out_specs=pl.BlockSpec(memory_space=pltpu.MemorySpace.VMEM),
    )(patches, prep["conv_w_bd"], prep["conv_b"], prep["lin_w"],
      prep["bn_g"], prep["bn_b"])
    return out[:, :output_size]


# ------------------------- reference & init (test) ---------------------------

def reference_forward(x, params, *, kernel_size=3, stride=2, padding=1,
                      sigmoid_scaling=1.0, eps=1e-5):
    """Pure-JAX mirror of the PyTorch module, for correctness checking."""
    wc, bc = params["conv_w"], params["conv_b"]
    wl, bl = params["lin_w"], params["lin_b"]
    gamma, beta = params["bn_g"], params["bn_b"]
    conv = jax.lax.conv_general_dilated(
        x, wc, window_strides=(stride, stride),
        padding=((padding, padding), (padding, padding)),
        dimension_numbers=("NCHW", "OIHW", "NCHW")) + bc[None, :, None, None]
    hrelu = jnp.maximum(conv, 0.0)
    flat = jnp.maximum(hrelu.reshape(x.shape[0], -1), 0.0)
    y = flat @ wl.T + bl
    mean = jnp.mean(y, axis=0, keepdims=True)
    var = jnp.mean((y - mean) ** 2, axis=0, keepdims=True)
    z = gamma * ((y - mean) * jax.lax.rsqrt(var + eps)) + beta
    return jax.nn.sigmoid(z * sigmoid_scaling)


def init_params(key, c, out_channels, kernel_size, conv_output_size,
                output_size):
    """Deterministic synthetic parameters (shapes match the torch module)."""
    k = jax.random.split(key, 4)
    conv_w = jax.random.uniform(
        k[0], (out_channels, c, kernel_size, kernel_size),
        minval=-0.2, maxval=0.2, dtype=jnp.float32)
    conv_b = jax.random.uniform(k[1], (out_channels,), minval=-0.2, maxval=0.2,
                                dtype=jnp.float32)
    lin_w = jax.random.uniform(k[2], (output_size, conv_output_size),
                               minval=-0.05, maxval=0.05, dtype=jnp.float32)
    lin_b = jax.random.uniform(k[3], (output_size,), minval=-0.05, maxval=0.05,
                               dtype=jnp.float32)
    return dict(conv_w=conv_w, conv_b=conv_b, lin_w=lin_w, lin_b=lin_b,
                bn_g=jnp.ones((output_size,), jnp.float32),   # BatchNorm1d defaults
                bn_b=jnp.zeros((output_size,), jnp.float32))


if __name__ == "__main__":
    # B=8 so the f32 output vreg sublanes are fully populated (review item:
    # don't benchmark at B=2 where 75% of every MXU row is padding).
    B, C, H, W = 8, 4, 16, 16
    output_size = 32
    kernel_size, stride, padding, out_channels = 3, 2, 1, 4
    sigmoid_scaling = 1.0
    OH, OW = conv_out_hw(H, W, kernel_size, stride, padding)
    conv_output_size = out_channels * OH * OW

    key = jax.random.PRNGKey(0)
    kx, kp = jax.random.split(key)
    x = jax.random.normal(kx, (B, C, H, W), dtype=jnp.float32)
    params = init_params(kp, C, out_channels, kernel_size, conv_output_size,
                         output_size)
    prep = prepare_params(params, image_shape=(C, H, W),
                          kernel_size=kernel_size, stride=stride,
                          padding=padding, sigmoid_scaling=sigmoid_scaling)

    out = art_head_forward(x, prep, output_size=output_size,
                           kernel_size=kernel_size, stride=stride,
                           padding=padding)
    out = jax.block_until_ready(out)
    assert out.shape == (B, output_size)
    assert bool(jnp.all(jnp.isfinite(out)))

    # Tight check against a precision-matched reference: same module math,
    # with x / conv_w / lin_w rounded to bf16 exactly as the kernel sees them
    # (f32 accumulation everywhere).  Isolates kernel-structure correctness
    # from the deliberate bf16 weight quantization.
    params_q = dict(params)
    params_q["conv_w"] = params["conv_w"].astype(jnp.bfloat16).astype(jnp.float32)
    params_q["lin_w"] = params["lin_w"].astype(jnp.bfloat16).astype(jnp.float32)
    x_q = x.astype(jnp.bfloat16).astype(jnp.float32)
    ref_q = reference_forward(x_q, params_q, kernel_size=kernel_size,
                              stride=stride, padding=padding,
                              sigmoid_scaling=sigmoid_scaling)
    assert bool(jnp.allclose(out, ref_q, atol=2e-3)), float(
        jnp.max(jnp.abs(out - ref_q)))

    # Loose check against the full-f32 reference: train-mode BatchNorm over a
    # small batch amplifies bf16 rounding on low-variance features, so the
    # tolerance here is coarser by design.
    ref = reference_forward(x, params, kernel_size=kernel_size, stride=stride,
                            padding=padding, sigmoid_scaling=sigmoid_scaling)
    assert bool(jnp.allclose(out, ref, atol=5e-2)), float(
        jnp.max(jnp.abs(out - ref)))

    print("KERNEL_OK")
</pallas_src>

<mosaic_0001>
module attributes {stable_mosaic.version = 11 : i64} {
  func.func @art_head_kernel(%arg0: memref<8x2304xbf16, #tpu.memory_space<vmem>>, %arg1: memref<2304x256xbf16, #tpu.memory_space<vmem>>, %arg2: memref<1x256xf32, #tpu.memory_space<vmem>>, %arg3: memref<256x128xbf16, #tpu.memory_space<vmem>>, %arg4: memref<1x128xf32, #tpu.memory_space<vmem>>, %arg5: memref<1x128xf32, #tpu.memory_space<vmem>>, %arg6: memref<8x128xf32, #tpu.memory_space<vmem>>) attributes {dimension_semantics = [], scalar_prefetch = 0 : i64, scratch_operands = 0 : i64, tpu.core_type = #tpu.core_type<tc>} {
    %c0 = arith.constant 0 : index
    %c0_0 = arith.constant 0 : index
    %0 = vector.load %arg0[%c0, %c0_0] : memref<8x2304xbf16, #tpu.memory_space<vmem>>, vector<8x2304xbf16>
    %c0_1 = arith.constant 0 : index
    %c0_2 = arith.constant 0 : index
    %1 = vector.load %arg1[%c0_1, %c0_2] : memref<2304x256xbf16, #tpu.memory_space<vmem>>, vector<2304x256xbf16>
    %cst = arith.constant dense<0.000000e+00> : vector<8x256xf32>
    %2 = tpu.matmul %0, %1, %cst {dimension_numbers = #tpu.dot_dimension_numbers<[1], [0], [0], [1], [0, 0, 1, 1], [], []>} : vector<8x2304xbf16>, vector<2304x256xbf16>, vector<8x256xf32> -> vector<8x256xf32>
    %c0_3 = arith.constant 0 : index
    %c0_4 = arith.constant 0 : index
    %3 = vector.load %arg2[%c0_3, %c0_4] : memref<1x256xf32, #tpu.memory_space<vmem>>, vector<1x256xf32>
    %4 = vector.broadcast %3 : vector<1x256xf32> to vector<8x256xf32>
    %5 = arith.addf %2, %4 : vector<8x256xf32>
    %cst_5 = arith.constant 0.000000e+00 : f32
    %6 = vector.broadcast %cst_5 : f32 to vector<8x256xf32>
    %7 = arith.maximumf %5, %6 : vector<8x256xf32>
    %c0_6 = arith.constant 0 : index
    %c0_7 = arith.constant 0 : index
    %8 = vector.load %arg3[%c0_6, %c0_7] : memref<256x128xbf16, #tpu.memory_space<vmem>>, vector<256x128xbf16>
    %9 = arith.extf %8 : vector<256x128xbf16> to vector<256x128xf32>
    %cst_8 = arith.constant dense<0.000000e+00> : vector<8x128xf32>
    %10 = tpu.matmul %7, %9, %cst_8 {dimension_numbers = #tpu.dot_dimension_numbers<[1], [0], [0], [1], [0, 0, 1, 1], [], []>} : vector<8x256xf32>, vector<256x128xf32>, vector<8x128xf32> -> vector<8x128xf32>
    %cst_9 = arith.constant dense<0.000000e+00> : vector<128xf32>
    %11 = vector.multi_reduction <add>, %10, %cst_9 [0] : vector<8x128xf32> to vector<128xf32>
    %12 = vector.shape_cast %11 : vector<128xf32> to vector<1x128xf32>
    %cst_10 = arith.constant 8.000000e+00 : f32
    %13 = vector.broadcast %cst_10 : f32 to vector<1x128xf32>
    %14 = arith.divf %12, %13 : vector<1x128xf32>
    %15 = vector.broadcast %14 : vector<1x128xf32> to vector<8x128xf32>
    %16 = arith.subf %10, %15 : vector<8x128xf32>
    %17 = arith.mulf %16, %16 : vector<8x128xf32>
    %cst_11 = arith.constant dense<0.000000e+00> : vector<128xf32>
    %18 = vector.multi_reduction <add>, %17, %cst_11 [0] : vector<8x128xf32> to vector<128xf32>
    %19 = vector.shape_cast %18 : vector<128xf32> to vector<1x128xf32>
    %cst_12 = arith.constant 8.000000e+00 : f32
    %20 = vector.broadcast %cst_12 : f32 to vector<1x128xf32>
    %21 = arith.divf %19, %20 : vector<1x128xf32>
    %c0_13 = arith.constant 0 : index
    %c0_14 = arith.constant 0 : index
    %22 = vector.load %arg4[%c0_13, %c0_14] : memref<1x128xf32, #tpu.memory_space<vmem>>, vector<1x128xf32>
    %23 = vector.broadcast %14 : vector<1x128xf32> to vector<8x128xf32>
    %24 = arith.subf %10, %23 : vector<8x128xf32>
    %cst_15 = arith.constant 9.99999974E-6 : f32
    %25 = vector.broadcast %cst_15 : f32 to vector<1x128xf32>
    %26 = arith.addf %21, %25 : vector<1x128xf32>
    %27 = math.rsqrt %26 : vector<1x128xf32>
    %28 = vector.broadcast %27 : vector<1x128xf32> to vector<8x128xf32>
    %29 = arith.mulf %24, %28 : vector<8x128xf32>
    %30 = vector.broadcast %22 : vector<1x128xf32> to vector<8x128xf32>
    %31 = arith.mulf %30, %29 : vector<8x128xf32>
    %c0_16 = arith.constant 0 : index
    %c0_17 = arith.constant 0 : index
    %32 = vector.load %arg5[%c0_16, %c0_17] : memref<1x128xf32, #tpu.memory_space<vmem>>, vector<1x128xf32>
    %33 = vector.broadcast %32 : vector<1x128xf32> to vector<8x128xf32>
    %34 = arith.addf %31, %33 : vector<8x128xf32>
    %35 = arith.negf %34 : vector<8x128xf32>
    %36 = math.exp %35 : vector<8x128xf32>
    %cst_18 = arith.constant 1.000000e+00 : f32
    %37 = vector.broadcast %cst_18 : f32 to vector<8x128xf32>
    %38 = arith.addf %37, %36 : vector<8x128xf32>
    %39 = arith.divf %37, %38 : vector<8x128xf32>
    %c0_19 = arith.constant 0 : index
    %c0_20 = arith.constant 0 : index
    %40 = vector.load %arg6[%c0_19, %c0_20] : memref<8x128xf32, #tpu.memory_space<vmem>>, vector<8x128xf32>
    tpu.vector_store %arg6[%c0_19, %c0_20], %39 {strides = array<i32>} : memref<8x128xf32, #tpu.memory_space<vmem>>, vector<8x128xf32>,
    return
  }
}

</mosaic_0001>

<bundles_post_ra>
// kernel: art_head_forward.1
= control target key start
LH: loop header
LB: loop body
LE: loop exit
PB: predicated region body
PF: predicated region fallthrough
CT: control target
= control target key end

     0   :  { %s4404_s0 = inlined_call_operand.vmem [shape: bf16[8,2304], index: 0, kind: input, shape index: {}]   ;;  %s4405_s1 = inlined_call_operand.vmem [shape: bf16[2304,256], index: 1, kind: input, shape index: {}]   ;;  %s4406_s2 = inlined_call_operand.vmem [shape: f32[1,256], index: 2, kind: input, shape index: {}]   ;;  %s4407_s3 = inlined_call_operand.vmem [shape: bf16[256,128], index: 3, kind: input, shape index: {}]   ;;  %s4408_s4 = inlined_call_operand.vmem [shape: f32[1,128], index: 4, kind: input, shape index: {}]   ;;  %s4409_s5 = inlined_call_operand.vmem [shape: f32[1,128], index: 5, kind: input, shape index: {}]   ;;  %s4410_s6 = inlined_call_operand.hbm [shape: f32[8,128], index: 6, kind: output, shape index: {}]  }
   0x1   :  { %v2886_v0 = vld [vmem:[%s4405_s1 + $0x4] ss:$8 sps:$4 sm:$0xff]   ;;  %v2890_v2 = vld [vmem:[%s4405_s1] ss:$8 sps:$4 sm:$0xff]   ;;  %v2892_v4 = vld [vmem:[%s4405_s1 + $0x14] ss:$8 sps:$4 sm:$0xff]  }
   0x2   :  { %v2888_v1 = vld [vmem:[%s4405_s1 + $0x404] ss:$8 sps:$4 sm:$0xff]   ;;  %1836 = vmatprep.subr.bf16.mxu1 %v2886_v0  ;;  %v2891_v3 = vld [vmem:[%s4405_s1 + $0x400] ss:$8 sps:$4 sm:$0xff]   ;;  %v2894_v5 = vld [vmem:[%s4405_s1 + $0x414] ss:$8 sps:$4 sm:$0xff]  }
   0x3   :  { %2000 = vmatprep.subr.bf16.mxu0 %v2888_v1  ;;  %1837 = vmatpush1.bf16.msra.mxu1 %v2890_v2  ;;  %v2896_v6 = vld [vmem:[%s4405_s1 + $0x10] ss:$8 sps:$4 sm:$0xff]   ;;  %v2898_v8 = vld [vmem:[%s4405_s1 + $0x24] ss:$8 sps:$4 sm:$0xff]   ;;  %v2902_v10 = vld [vmem:[%s4405_s1 + $0x20] ss:$8 sps:$4 sm:$0xff]  }
   0x4   :  { %2001 = vmatpush1.bf16.msra.mxu0 %v2891_v3  ;;  %1838 = vmatprep.subr.bf16.mxu1 %v2892_v4  ;;  %v2897_v7 = vld [vmem:[%s4405_s1 + $0x410] ss:$8 sps:$4 sm:$0xff]   ;;  %v2900_v9 = vld [vmem:[%s4405_s1 + $0x424] ss:$8 sps:$4 sm:$0xff]   ;;  %v2903_v11 = vld [vmem:[%s4405_s1 + $0x420] ss:$8 sps:$4 sm:$0xff]  }
   0x5   :  { %2002 = vmatprep.subr.bf16.mxu0 %v2894_v5  ;;  %v2904_v12 = vld [vmem:[%s4405_s1 + $0x34] ss:$8 sps:$4 sm:$0xff]   ;;  %v2908_v14 = vld [vmem:[%s4405_s1 + $0x30] ss:$8 sps:$4 sm:$0xff]   ;;  %v2910_v16 = vld [vmem:[%s4405_s1 + $0x44] ss:$8 sps:$4 sm:$0xff]  }
   0x6   :  { %v2906_v13 = vld [vmem:[%s4405_s1 + $0x434] ss:$8 sps:$4 sm:$0xff]   ;;  %v2909_v15 = vld [vmem:[%s4405_s1 + $0x430] ss:$8 sps:$4 sm:$0xff]   ;;  %v2912_v17 = vld [vmem:[%s4405_s1 + $0x444] ss:$8 sps:$4 sm:$0xff]  }
   0x7   :  { %1839 = vmatpush1.bf16.msra.mxu1 %v2896_v6  ;;  %v2914_v18 = vld [vmem:[%s4405_s1 + $0x40] ss:$8 sps:$4 sm:$0xff]   ;;  %v2916_v20 = vld [vmem:[%s4405_s1 + $0x54] ss:$8 sps:$4 sm:$0xff]   ;;  %v2920_v22 = vld [vmem:[%s4405_s1 + $0x50] ss:$8 sps:$4 sm:$0xff]  }
   0x8   :  { %2003 = vmatpush1.bf16.msra.mxu0 %v2897_v7  ;;  %1840 = vmatprep.subr.bf16.mxu1 %v2898_v8  ;;  %v2915_v19 = vld [vmem:[%s4405_s1 + $0x440] ss:$8 sps:$4 sm:$0xff]   ;;  %v2918_v21 = vld [vmem:[%s4405_s1 + $0x454] ss:$8 sps:$4 sm:$0xff]   ;;  %v2921_v23 = vld [vmem:[%s4405_s1 + $0x450] ss:$8 sps:$4 sm:$0xff]  }
   0x9   :  { %2004 = vmatprep.subr.bf16.mxu0 %v2900_v9  ;;  %v2922_v24 = vld [vmem:[%s4405_s1 + $0x64] ss:$8 sps:$4 sm:$0xff]   ;;  %v2926_v26 = vld [vmem:[%s4405_s1 + $0x60] ss:$8 sps:$4 sm:$0xff]   ;;  %v2928_v28 = vld [vmem:[%s4405_s1 + $0x74] ss:$8 sps:$4 sm:$0xff]  }
   0xa   :  { %v2924_v25 = vld [vmem:[%s4405_s1 + $0x464] ss:$8 sps:$4 sm:$0xff]   ;;  %v2927_v27 = vld [vmem:[%s4405_s1 + $0x460] ss:$8 sps:$4 sm:$0xff]   ;;  %v2930_v29 = vld [vmem:[%s4405_s1 + $0x474] ss:$8 sps:$4 sm:$0xff]  }
   0xb   :  { %1841 = vmatpush1.bf16.msra.mxu1 %v2902_v10  ;;  %v2932_v30 = vld [vmem:[%s4405_s1 + $0x70] ss:$8 sps:$4 sm:$0xff]   ;;  %v2934_v32 = vld [vmem:[%s4405_s1 + $0x84] ss:$8 sps:$4 sm:$0xff]   ;;  %v2938_v34 = vld [vmem:[%s4405_s1 + $0x80] ss:$8 sps:$4 sm:$0xff]  }
   0xc   :  { %2005 = vmatpush1.bf16.msra.mxu0 %v2903_v11  ;;  %1842 = vmatprep.subr.bf16.mxu1 %v2904_v12  ;;  %v2933_v31 = vld [vmem:[%s4405_s1 + $0x470] ss:$8 sps:$4 sm:$0xff]   ;;  %v2936_v33 = vld [vmem:[%s4405_s1 + $0x484] ss:$8 sps:$4 sm:$0xff]   ;;  %v2939_v35 = vld [vmem:[%s4405_s1 + $0x480] ss:$8 sps:$4 sm:$0xff]  }
   0xd   :  { %2006 = vmatprep.subr.bf16.mxu0 %v2906_v13  ;;  %v2940_v36 = vld [vmem:[%s4405_s1 + $0x94] ss:$8 sps:$4 sm:$0xff]   ;;  %v2944_v38 = vld [vmem:[%s4405_s1 + $0x90] ss:$8 sps:$4 sm:$0xff]   ;;  %v2946_v40 = vld [vmem:[%s4405_s1 + $0xa4] ss:$8 sps:$4 sm:$0xff]  }
   0xe   :  { %v2942_v37 = vld [vmem:[%s4405_s1 + $0x494] ss:$8 sps:$4 sm:$0xff]   ;;  %v2945_v39 = vld [vmem:[%s4405_s1 + $0x490] ss:$8 sps:$4 sm:$0xff]   ;;  %v2948_v41 = vld [vmem:[%s4405_s1 + $0x4a4] ss:$8 sps:$4 sm:$0xff]  }
   0xf   :  { %1843 = vmatpush1.bf16.msra.mxu1 %v2908_v14  ;;  %v2950_v42 = vld [vmem:[%s4405_s1 + $0xa0] ss:$8 sps:$4 sm:$0xff]   ;;  %v2952_v44 = vld [vmem:[%s4405_s1 + $0xb4] ss:$8 sps:$4 sm:$0xff]   ;;  %v2956_v47 = vld [vmem:[%s4405_s1 + $0xb0] ss:$8 sps:$4 sm:$0xff]  }
  0x10   :  { %2007 = vmatpush1.bf16.msra.mxu0 %v2909_v15  ;;  %1844 = vmatprep.subr.bf16.mxu1 %v2910_v16  ;;  %v2951_v43 = vld [vmem:[%s4405_s1 + $0x4a0] ss:$8 sps:$4 sm:$0xff]   ;;  %v2954_v45 = vld [vmem:[%s4405_s1 + $0x4b4] ss:$8 sps:$4 sm:$0xff]   ;;  %v2957_v49 = vld [vmem:[%s4405_s1 + $0x4b0] ss:$8 sps:$4 sm:$0xff]  }
  0x11   :  { %2008 = vmatprep.subr.bf16.mxu0 %v2912_v17  ;;  %v24_v46 = vld [vmem:[%s4404_s0] sm:$0xff]  ;;  %v2964_v56 = vld [vmem:[%s4405_s1 + $0xd4] ss:$8 sps:$4 sm:$0xff]   ;;  %v2968_v58 = vld [vmem:[%s4405_s1 + $0xd0] ss:$8 sps:$4 sm:$0xff]  }
  0x12   :  { %v2399_v48 = vcombine.high %v24_v46, %v24_v46  ;;  %v28_v50 = vld [vmem:[%s4404_s0 + $0x20] sm:$0xff]  ;;  %v2966_v57 = vld [vmem:[%s4405_s1 + $0x4d4] ss:$8 sps:$4 sm:$0xff]   ;;  %v2969_v59 = vld [vmem:[%s4405_s1 + $0x4d0] ss:$8 sps:$4 sm:$0xff]   ;;  %v2398_v6 = vcombine.low %v24_v46, %v24_v46 }
  0x13   :  { %1845 = vmatpush1.bf16.msra.mxu1 %v2914_v18  ;;  %v2958_v51 = vld [vmem:[%s4405_s1 + $0xc4] ss:$8 sps:$4 sm:$0xff]   ;;  %v2407_v53 = vcombine.high %v28_v50, %v28_v50  ;;  %v2962_v54 = vld [vmem:[%s4405_s1 + $0xc0] ss:$8 sps:$4 sm:$0xff]   ;;  %v2976_v0 = vld [vmem:[%s4405_s1 + $0xf4] ss:$8 sps:$4 sm:$0xff]   ;;  %v2406_v7 = vcombine.low %v28_v50, %v28_v50 }
  0x14   :  { %2009 = vmatpush1.bf16.msra.mxu0 %v2915_v19  ;;  %1846 = vmatprep.subr.bf16.mxu1 %v2916_v20  ;;  %v2960_v52 = vld [vmem:[%s4405_s1 + $0x4c4] ss:$8 sps:$4 sm:$0xff]   ;;  %v2963_v55 = vld [vmem:[%s4405_s1 + $0x4c0] ss:$8 sps:$4 sm:$0xff]   ;;  %v2978_v1 = vld [vmem:[%s4405_s1 + $0x4f4] ss:$8 sps:$4 sm:$0xff]  }
  0x15   :  { %2010 = vmatprep.subr.bf16.mxu0 %v2918_v21  ;;  %1868 = vmatprep.mubr.bf16.mxu1 %v2399_v48  ;;  %v2970_v60 = vld [vmem:[%s4405_s1 + $0xe4] ss:$8 sps:$4 sm:$0xff]   ;;  %v2974_v62 = vld [vmem:[%s4405_s1 + $0xe0] ss:$8 sps:$4 sm:$0xff]   ;;  %v2980_v2 = vld [vmem:[%s4405_s1 + $0xf0] ss:$8 sps:$4 sm:$0xff]  }
  0x16   :  { %2032 = vmatprep.mubr.bf16.mxu0 %v2407_v53  ;;  %v2972_v61 = vld [vmem:[%s4405_s1 + $0x4e4] ss:$8 sps:$4 sm:$0xff]   ;;  %v2975_v63 = vld [vmem:[%s4405_s1 + $0x4e0] ss:$8 sps:$4 sm:$0xff]   ;;  %v2981_v3 = vld [vmem:[%s4405_s1 + $0x4f0] ss:$8 sps:$4 sm:$0xff]  }
  0x17   :  { %1847 = vmatpush1.bf16.msra.mxu1 %v2920_v22  ;;  %v2986_v4 = vld [vmem:[%s4405_s1 + $0x104] ss:$8 sps:$4 sm:$0xff]   ;;  %v2984_v8 = vld [vmem:[%s4405_s1 + $0x100] ss:$8 sps:$4 sm:$0xff]   ;;  %v2994_v10 = vld [vmem:[%s4405_s1 + $0x114] ss:$8 sps:$4 sm:$0xff]  }
  0x18   :  { %2011 = vmatpush1.bf16.msra.mxu0 %v2921_v23  ;;  %1848 = vmatprep.subr.bf16.mxu1 %v2922_v24  ;;  %v2991_v5 = vld [vmem:[%s4405_s1 + $0x504] ss:$8 sps:$4 sm:$0xff]   ;;  %v2989_v9 = vld [vmem:[%s4405_s1 + $0x500] ss:$8 sps:$4 sm:$0xff]   ;;  %v2997_v11 = vld [vmem:[%s4405_s1 + $0x514] ss:$8 sps:$4 sm:$0xff]  }
  0x19   :  { %2012 = vmatprep.subr.bf16.mxu0 %v2924_v25  ;;  %v2992_v12 = vld [vmem:[%s4405_s1 + $0x110] ss:$8 sps:$4 sm:$0xff]   ;;  %v3000_v14 = vld [vmem:[%s4405_s1 + $0x124] ss:$8 sps:$4 sm:$0xff]   ;;  %v2998_v16 = vld [vmem:[%s4405_s1 + $0x120] ss:$8 sps:$4 sm:$0xff]  }
  0x1a   :  { %v2995_v13 = vld [vmem:[%s4405_s1 + $0x510] ss:$8 sps:$4 sm:$0xff]   ;;  %v3003_v15 = vld [vmem:[%s4405_s1 + $0x524] ss:$8 sps:$4 sm:$0xff]   ;;  %v3001_v17 = vld [vmem:[%s4405_s1 + $0x520] ss:$8 sps:$4 sm:$0xff]  }
  0x1b   :  { %1849 = vmatpush1.bf16.msra.mxu1 %v2926_v26  ;;  %v3006_v18 = vld [vmem:[%s4405_s1 + $0x134] ss:$8 sps:$4 sm:$0xff]   ;;  %v3004_v20 = vld [vmem:[%s4405_s1 + $0x130] ss:$8 sps:$4 sm:$0xff]   ;;  %v3012_v22 = vld [vmem:[%s4405_s1 + $0x144] ss:$8 sps:$4 sm:$0xff]  }
  0x1c   :  { %2013 = vmatpush1.bf16.msra.mxu0 %v2927_v27  ;;  %1850 = vmatprep.subr.bf16.mxu1 %v2928_v28  ;;  %v3009_v19 = vld [vmem:[%s4405_s1 + $0x534] ss:$8 sps:$4 sm:$0xff]   ;;  %v3007_v21 = vld [vmem:[%s4405_s1 + $0x530] ss:$8 sps:$4 sm:$0xff]   ;;  %v3015_v23 = vld [vmem:[%s4405_s1 + $0x544] ss:$8 sps:$4 sm:$0xff]  }
  0x1d   :  { %2014 = vmatprep.subr.bf16.mxu0 %v2930_v29  ;;  %v3010_v24 = vld [vmem:[%s4405_s1 + $0x140] ss:$8 sps:$4 sm:$0xff]   ;;  %v3018_v26 = vld [vmem:[%s4405_s1 + $0x154] ss:$8 sps:$4 sm:$0xff]   ;;  %v3016_v28 = vld [vmem:[%s4405_s1 + $0x150] ss:$8 sps:$4 sm:$0xff]  }
  0x1e   :  { %v3013_v25 = vld [vmem:[%s4405_s1 + $0x540] ss:$8 sps:$4 sm:$0xff]   ;;  %v3021_v27 = vld [vmem:[%s4405_s1 + $0x554] ss:$8 sps:$4 sm:$0xff]   ;;  %v3019_v29 = vld [vmem:[%s4405_s1 + $0x550] ss:$8 sps:$4 sm:$0xff]  }
  0x1f   :  { %1851 = vmatpush1.bf16.msra.mxu1 %v2932_v30  ;;  %v3024_v30 = vld [vmem:[%s4405_s1 + $0x164] ss:$8 sps:$4 sm:$0xff]   ;;  %v3042_v46 = vld [vmem:[%s4405_s1 + $0x194] ss:$8 sps:$4 sm:$0xff]   ;;  %v3040_v48 = vld [vmem:[%s4405_s1 + $0x190] ss:$8 sps:$4 sm:$0xff]  }
  0x20   :  { %2015 = vmatpush1.bf16.msra.mxu0 %v2933_v31  ;;  %1852 = vmatprep.subr.bf16.mxu1 %v2934_v32  ;;  %v3027_v31 = vld [vmem:[%s4405_s1 + $0x564] ss:$8 sps:$4 sm:$0xff]   ;;  %v3049_v53 = vld [vmem:[%s4405_s1 + $0x5a0] ss:$8 sps:$4 sm:$0xff]  }
  0x21   :  { %2016 = vmatprep.subr.bf16.mxu0 %v2936_v33  ;;  %v3681_v32 = vld [vmem:[%s4404_s0 + $0x8] sm:$0xff] }
  0x22   :  { %v3022_v33 = vld [vmem:[%s4405_s1 + $0x160] ss:$8 sps:$4 sm:$0xff]   ;;  %v3048_v50 = vld [vmem:[%s4405_s1 + $0x1a4] ss:$8 sps:$4 sm:$0xff]  }
  0x23   :  { %1853 = vmatpush1.bf16.msra.mxu1 %v2938_v34  ;;  %v3025_v34 = vld [vmem:[%s4405_s1 + $0x560] ss:$8 sps:$4 sm:$0xff]  }
  0x24   :  { %2017 = vmatpush1.bf16.msra.mxu0 %v2939_v35  ;;  %1854 = vmatprep.subr.bf16.mxu1 %v2940_v36  ;;  %v2401_v35 = vcombine.high %v3681_v32, %v3681_v32  ;;  %v3694_v36 = vld [vmem:[%s4404_s0 + $0x28] sm:$0xff] }
  0x25   :  { %2018 = vmatprep.subr.bf16.mxu0 %v2942_v37  ;;  %v3030_v37 = vld [vmem:[%s4405_s1 + $0x174] ss:$8 sps:$4 sm:$0xff]  }
  0x27   :  { %1855 = vmatpush1.bf16.msra.mxu1 %v2944_v38  ;;  %v2409_v38 = vcombine.high %v3694_v36, %v3694_v36 }
  0x28   :  { %2019 = vmatpush1.bf16.msra.mxu0 %v2945_v39  ;;  %1856 = vmatprep.subr.bf16.mxu1 %v2946_v40  ;;  %v3033_v39 = vld [vmem:[%s4405_s1 + $0x574] ss:$8 sps:$4 sm:$0xff]   ;;  %v3028_v40 = vld [vmem:[%s4405_s1 + $0x170] ss:$8 sps:$4 sm:$0xff]  }
  0x29   :  { %2020 = vmatprep.subr.bf16.mxu0 %v2948_v41  ;;  %v3031_v41 = vld [vmem:[%s4405_s1 + $0x570] ss:$8 sps:$4 sm:$0xff]  }
  0x2b   :  { %1857 = vmatpush1.bf16.msra.mxu1 %v2950_v42  ;;  %v3036_v42 = vld [vmem:[%s4405_s1 + $0x184] ss:$8 sps:$4 sm:$0xff]  }
  0x2c   :  { %2021 = vmatpush1.bf16.msra.mxu0 %v2951_v43  ;;  %1858 = vmatprep.subr.bf16.mxu1 %v2952_v44  ;;  %v3039_v43 = vld [vmem:[%s4405_s1 + $0x584] ss:$8 sps:$4 sm:$0xff]   ;;  %v3034_v44 = vld [vmem:[%s4405_s1 + $0x180] ss:$8 sps:$4 sm:$0xff]  }
  0x2d   :  { %2022 = vmatprep.subr.bf16.mxu0 %v2954_v45  ;;  %v3037_v45 = vld [vmem:[%s4405_s1 + $0x580] ss:$8 sps:$4 sm:$0xff]  }
  0x2f   :  { %1859 = vmatpush1.bf16.msra.mxu1 %v2956_v47  ;;  %v3045_v47 = vld [vmem:[%s4405_s1 + $0x594] ss:$8 sps:$4 sm:$0xff]  }
  0x30   :  { %2023 = vmatpush1.bf16.msra.mxu0 %v2957_v49  ;;  %1860 = vmatprep.subr.bf16.mxu1 %v2958_v51  ;;  %v3043_v49 = vld [vmem:[%s4405_s1 + $0x590] ss:$8 sps:$4 sm:$0xff]   ;;  %v3051_v51 = vld [vmem:[%s4405_s1 + $0x5a4] ss:$8 sps:$4 sm:$0xff]  }
  0x31   :  { %2024 = vmatprep.subr.bf16.mxu0 %v2960_v52  ;;  %v3046_v52 = vld [vmem:[%s4405_s1 + $0x1a0] ss:$8 sps:$4 sm:$0xff]  }
  0x33   :  { %1861 = vmatpush1.bf16.msra.mxu1 %v2962_v54  ;;  %v3054_v54 = vld [vmem:[%s4405_s1 + $0x1b4] ss:$8 sps:$4 sm:$0xff]  }
  0x34   :  { %2025 = vmatpush1.bf16.msra.mxu0 %v2963_v55  ;;  %1862 = vmatprep.subr.bf16.mxu1 %v2964_v56  ;;  %v3057_v55 = vld [vmem:[%s4405_s1 + $0x5b4] ss:$8 sps:$4 sm:$0xff]   ;;  %v3052_v56 = vld [vmem:[%s4405_s1 + $0x1b0] ss:$8 sps:$4 sm:$0xff]  }
  0x35   :  { %2026 = vmatprep.subr.bf16.mxu0 %v2966_v57  ;;  %v3055_v57 = vld [vmem:[%s4405_s1 + $0x5b0] ss:$8 sps:$4 sm:$0xff]  }
  0x37   :  { %1863 = vmatpush1.bf16.msra.mxu1 %v2968_v58  ;;  %v3060_v58 = vld [vmem:[%s4405_s1 + $0x1c4] ss:$8 sps:$4 sm:$0xff]  }
  0x38   :  { %2027 = vmatpush1.bf16.msra.mxu0 %v2969_v59  ;;  %1864 = vmatprep.subr.bf16.mxu1 %v2970_v60  ;;  %v3063_v59 = vld [vmem:[%s4405_s1 + $0x5c4] ss:$8 sps:$4 sm:$0xff]   ;;  %v3058_v60 = vld [vmem:[%s4405_s1 + $0x1c0] ss:$8 sps:$4 sm:$0xff]  }
  0x39   :  { %2028 = vmatprep.subr.bf16.mxu0 %v2972_v61  ;;  %v3061_v61 = vld [vmem:[%s4405_s1 + $0x5c0] ss:$8 sps:$4 sm:$0xff]  }
  0x3b   :  { %1865 = vmatpush1.bf16.msra.mxu1 %v2974_v62  ;;  %v3066_v62 = vld [vmem:[%s4405_s1 + $0x1d4] ss:$8 sps:$4 sm:$0xff]  }
  0x3c   :  { %2029 = vmatpush1.bf16.msra.mxu0 %v2975_v63  ;;  %1866 = vmatprep.subr.bf16.mxu1 %v2976_v0  ;;  %v3069_v63 = vld [vmem:[%s4405_s1 + $0x5d4] ss:$8 sps:$4 sm:$0xff]   ;;  %v3064_v0 = vld [vmem:[%s4405_s1 + $0x1d0] ss:$8 sps:$4 sm:$0xff]  }
  0x3d   :  { %2030 = vmatprep.subr.bf16.mxu0 %v2978_v1  ;;  %v3067_v1 = vld [vmem:[%s4405_s1 + $0x5d0] ss:$8 sps:$4 sm:$0xff]  }
  0x3f   :  { %1867 = vmatpush1.bf16.msra.mxu1 %v2980_v2  ;;  %v3072_v2 = vld [vmem:[%s4405_s1 + $0x1e4] ss:$8 sps:$4 sm:$0xff]  }
  0x40   :  { %2031 = vmatpush1.bf16.msra.mxu0 %v2981_v3  ;;  %1877 = vmatprep.subr.bf16.mxu1 %v2986_v4  ;;  %v3075_v3 = vld [vmem:[%s4405_s1 + $0x5e4] ss:$8 sps:$4 sm:$0xff]   ;;  %v3070_v4 = vld [vmem:[%s4405_s1 + $0x1e0] ss:$8 sps:$4 sm:$0xff]  }
  0x41   :  { %2041 = vmatprep.subr.bf16.mxu0 %v2991_v5  ;;  %v3073_v5 = vld [vmem:[%s4405_s1 + $0x5e0] ss:$8 sps:$4 sm:$0xff]  }
  0x42   :  { %1869 = vmatmul.mubr.bf16.vlgmr.msra.gmra.mrb[0].mxu1 %v2398_v6  ;;  %v3078_v6 = vld [vmem:[%s4405_s1 + $0x1f4] ss:$8 sps:$4 sm:$0xff]  }
  0x43   :  { %2033 = vmatmul.mubr.bf16.vlgmr.msra.gmra.mrb[0].mxu0 %v2406_v7  ;;  %1878 = vmatpush1.bf16.msra.mxu1 %v2984_v8  ;;  %v3081_v7 = vld [vmem:[%s4405_s1 + $0x5f4] ss:$8 sps:$4 sm:$0xff]   ;;  %v3076_v8 = vld [vmem:[%s4405_s1 + $0x1f0] ss:$8 sps:$4 sm:$0xff]  }
  0x44   :  { %2042 = vmatpush1.bf16.msra.mxu0 %v2989_v9  ;;  %1879 = vmatprep.subr.bf16.mxu1 %v2994_v10  ;;  %v3079_v9 = vld [vmem:[%s4405_s1 + $0x5f0] ss:$8 sps:$4 sm:$0xff]   ;;  %v3086_v10 = vld [vmem:[%s4405_s1 + $0x204] ss:$8 sps:$4 sm:$0xff]  }
  0x45   :  { %2043 = vmatprep.subr.bf16.mxu0 %v2997_v11  ;;  %1909 = vmatprep.mubr.bf16.mxu1 %v2401_v35  ;;  %v3091_v11 = vld [vmem:[%s4405_s1 + $0x604] ss:$8 sps:$4 sm:$0xff]   ;;  %v3113_v35 = vld [vmem:[%s4405_s1 + $0x640] ss:$8 sps:$4 sm:$0xff]  }
  0x46   :  { %2073 = vmatprep.mubr.bf16.mxu0 %v2409_v38  ;;  %v3116_v38 = vld [vmem:[%s4405_s1 + $0x250] ss:$8 sps:$4 sm:$0xff]  }
  0x47   :  { %1880 = vmatpush1.bf16.msra.mxu1 %v2992_v12  ;;  %v2400_v12 = vcombine.low %v3681_v32, %v3681_v32  ;;  %v3112_v32 = vld [vmem:[%s4405_s1 + $0x244] ss:$8 sps:$4 sm:$0xff]  }
  0x48   :  { %2044 = vmatpush1.bf16.msra.mxu0 %v2995_v13  ;;  %1881 = vmatprep.subr.bf16.mxu1 %v3000_v14  ;;  %v3084_v13 = vld [vmem:[%s4405_s1 + $0x200] ss:$8 sps:$4 sm:$0xff]   ;;  %v2408_v14 = vcombine.low %v3694_v36, %v3694_v36  ;;  %v3118_v36 = vld [vmem:[%s4405_s1 + $0x254] ss:$8 sps:$4 sm:$0xff]  }
  0x49   :  { %2045 = vmatprep.subr.bf16.mxu0 %v3003_v15  ;;  %v3089_v15 = vld [vmem:[%s4405_s1 + $0x600] ss:$8 sps:$4 sm:$0xff]  }
  0x4b   :  { %1882 = vmatpush1.bf16.msra.mxu1 %v2998_v16  ;;  %v3094_v16 = vld [vmem:[%s4405_s1 + $0x214] ss:$8 sps:$4 sm:$0xff]  }
  0x4c   :  { %2046 = vmatpush1.bf16.msra.mxu0 %v3001_v17  ;;  %1883 = vmatprep.subr.bf16.mxu1 %v3006_v18  ;;  %v3097_v17 = vld [vmem:[%s4405_s1 + $0x614] ss:$8 sps:$4 sm:$0xff]  }
  0x4d   :  { %2047 = vmatprep.subr.bf16.mxu0 %v3009_v19  ;;  %v3831_v18 = vld [vmem:[%s4404_s0 + $0x10] sm:$0xff] }
  0x4e   :  { %v2403_v19 = vcombine.high %v3831_v18, %v3831_v18 }
  0x4f   :  { %1884 = vmatpush1.bf16.msra.mxu1 %v3004_v20  ;;  %v3838_v20 = vld [vmem:[%s4404_s0 + $0x30] sm:$0xff] }
  0x50   :  { %2048 = vmatpush1.bf16.msra.mxu0 %v3007_v21  ;;  %1885 = vmatprep.subr.bf16.mxu1 %v3012_v22  ;;  %v3092_v21 = vld [vmem:[%s4405_s1 + $0x210] ss:$8 sps:$4 sm:$0xff]  }
  0x51   :  { %2049 = vmatprep.subr.bf16.mxu0 %v3015_v23  ;;  %v3095_v22 = vld [vmem:[%s4405_s1 + $0x610] ss:$8 sps:$4 sm:$0xff]   ;;  %v2411_v23 = vcombine.high %v3838_v20, %v3838_v20 }
  0x53   :  { %1886 = vmatpush1.bf16.msra.mxu1 %v3010_v24  ;;  %v3100_v24 = vld [vmem:[%s4405_s1 + $0x224] ss:$8 sps:$4 sm:$0xff]  }
  0x54   :  { %2050 = vmatpush1.bf16.msra.mxu0 %v3013_v25  ;;  %1887 = vmatprep.subr.bf16.mxu1 %v3018_v26  ;;  %v3103_v25 = vld [vmem:[%s4405_s1 + $0x624] ss:$8 sps:$4 sm:$0xff]   ;;  %v3098_v26 = vld [vmem:[%s4405_s1 + $0x220] ss:$8 sps:$4 sm:$0xff]  }
  0x55   :  { %2051 = vmatprep.subr.bf16.mxu0 %v3021_v27  ;;  %v3101_v27 = vld [vmem:[%s4405_s1 + $0x620] ss:$8 sps:$4 sm:$0xff]  }
  0x57   :  { %1888 = vmatpush1.bf16.msra.mxu1 %v3016_v28  ;;  %v3106_v28 = vld [vmem:[%s4405_s1 + $0x234] ss:$8 sps:$4 sm:$0xff]  }
  0x58   :  { %2052 = vmatpush1.bf16.msra.mxu0 %v3019_v29  ;;  %1889 = vmatprep.subr.bf16.mxu1 %v3024_v30  ;;  %v3109_v29 = vld [vmem:[%s4405_s1 + $0x634] ss:$8 sps:$4 sm:$0xff]   ;;  %v3104_v30 = vld [vmem:[%s4405_s1 + $0x230] ss:$8 sps:$4 sm:$0xff]  }
  0x59   :  { %2053 = vmatprep.subr.bf16.mxu0 %v3027_v31  ;;  %v3107_v31 = vld [vmem:[%s4405_s1 + $0x630] ss:$8 sps:$4 sm:$0xff]  }
  0x5b   :  { %1890 = vmatpush1.bf16.msra.mxu1 %v3022_v33  ;;  %v3115_v33 = vld [vmem:[%s4405_s1 + $0x644] ss:$8 sps:$4 sm:$0xff]  }
  0x5c   :  { %2054 = vmatpush1.bf16.msra.mxu0 %v3025_v34  ;;  %1891 = vmatprep.subr.bf16.mxu1 %v3030_v37  ;;  %v3110_v34 = vld [vmem:[%s4405_s1 + $0x240] ss:$8 sps:$4 sm:$0xff]   ;;  %v3121_v37 = vld [vmem:[%s4405_s1 + $0x654] ss:$8 sps:$4 sm:$0xff]  }
  0x5d   :  { %2055 = vmatprep.subr.bf16.mxu0 %v3033_v39  ;;  %v3119_v39 = vld [vmem:[%s4405_s1 + $0x650] ss:$8 sps:$4 sm:$0xff]  }
  0x5f   :  { %1892 = vmatpush1.bf16.msra.mxu1 %v3028_v40  ;;  %v3124_v40 = vld [vmem:[%s4405_s1 + $0x264] ss:$8 sps:$4 sm:$0xff]  }
  0x60   :  { %2056 = vmatpush1.bf16.msra.mxu0 %v3031_v41  ;;  %1893 = vmatprep.subr.bf16.mxu1 %v3036_v42  ;;  %v3127_v41 = vld [vmem:[%s4405_s1 + $0x664] ss:$8 sps:$4 sm:$0xff]   ;;  %v3122_v42 = vld [vmem:[%s4405_s1 + $0x260] ss:$8 sps:$4 sm:$0xff]  }
  0x61   :  { %2057 = vmatprep.subr.bf16.mxu0 %v3039_v43  ;;  %v3125_v43 = vld [vmem:[%s4405_s1 + $0x660] ss:$8 sps:$4 sm:$0xff]  }
  0x63   :  { %1894 = vmatpush1.bf16.msra.mxu1 %v3034_v44  ;;  %v3130_v44 = vld [vmem:[%s4405_s1 + $0x274] ss:$8 sps:$4 sm:$0xff]  }
  0x64   :  { %2058 = vmatpush1.bf16.msra.mxu0 %v3037_v45  ;;  %1895 = vmatprep.subr.bf16.mxu1 %v3042_v46  ;;  %v3133_v45 = vld [vmem:[%s4405_s1 + $0x674] ss:$8 sps:$4 sm:$0xff]   ;;  %v3128_v46 = vld [vmem:[%s4405_s1 + $0x270] ss:$8 sps:$4 sm:$0xff]  }
  0x65   :  { %2059 = vmatprep.subr.bf16.mxu0 %v3045_v47  ;;  %v3131_v47 = vld [vmem:[%s4405_s1 + $0x670] ss:$8 sps:$4 sm:$0xff]  }
  0x67   :  { %1896 = vmatpush1.bf16.msra.mxu1 %v3040_v48  ;;  %v3136_v48 = vld [vmem:[%s4405_s1 + $0x284] ss:$8 sps:$4 sm:$0xff]  }
  0x68   :  { %2060 = vmatpush1.bf16.msra.mxu0 %v3043_v49  ;;  %1897 = vmatprep.subr.bf16.mxu1 %v3048_v50  ;;  %v3139_v49 = vld [vmem:[%s4405_s1 + $0x684] ss:$8 sps:$4 sm:$0xff]   ;;  %v3134_v50 = vld [vmem:[%s4405_s1 + $0x280] ss:$8 sps:$4 sm:$0xff]  }
  0x69   :  { %2061 = vmatprep.subr.bf16.mxu0 %v3051_v51  ;;  %v3137_v51 = vld [vmem:[%s4405_s1 + $0x680] ss:$8 sps:$4 sm:$0xff]  }
  0x6b   :  { %1898 = vmatpush1.bf16.msra.mxu1 %v3046_v52  ;;  %v3142_v52 = vld [vmem:[%s4405_s1 + $0x294] ss:$8 sps:$4 sm:$0xff]  }
  0x6c   :  { %2062 = vmatpush1.bf16.msra.mxu0 %v3049_v53  ;;  %1899 = vmatprep.subr.bf16.mxu1 %v3054_v54  ;;  %v3145_v53 = vld [vmem:[%s4405_s1 + $0x694] ss:$8 sps:$4 sm:$0xff]   ;;  %v3140_v54 = vld [vmem:[%s4405_s1 + $0x290] ss:$8 sps:$4 sm:$0xff]  }
  0x6d   :  { %2063 = vmatprep.subr.bf16.mxu0 %v3057_v55  ;;  %v3143_v55 = vld [vmem:[%s4405_s1 + $0x690] ss:$8 sps:$4 sm:$0xff]  }
  0x6f   :  { %1900 = vmatpush1.bf16.msra.mxu1 %v3052_v56  ;;  %v3148_v56 = vld [vmem:[%s4405_s1 + $0x2a4] ss:$8 sps:$4 sm:$0xff]  }
  0x70   :  { %2064 = vmatpush1.bf16.msra.mxu0 %v3055_v57  ;;  %1901 = vmatprep.subr.bf16.mxu1 %v3060_v58  ;;  %v3151_v57 = vld [vmem:[%s4405_s1 + $0x6a4] ss:$8 sps:$4 sm:$0xff]   ;;  %v3146_v58 = vld [vmem:[%s4405_s1 + $0x2a0] ss:$8 sps:$4 sm:$0xff]  }
  0x71   :  { %2065 = vmatprep.subr.bf16.mxu0 %v3063_v59  ;;  %v3149_v59 = vld [vmem:[%s4405_s1 + $0x6a0] ss:$8 sps:$4 sm:$0xff]  }
  0x73   :  { %1902 = vmatpush1.bf16.msra.mxu1 %v3058_v60  ;;  %v3154_v60 = vld [vmem:[%s4405_s1 + $0x2b4] ss:$8 sps:$4 sm:$0xff]  }
  0x74   :  { %2066 = vmatpush1.bf16.msra.mxu0 %v3061_v61  ;;  %1903 = vmatprep.subr.bf16.mxu1 %v3066_v62  ;;  %v3157_v61 = vld [vmem:[%s4405_s1 + $0x6b4] ss:$8 sps:$4 sm:$0xff]   ;;  %v3152_v62 = vld [vmem:[%s4405_s1 + $0x2b0] ss:$8 sps:$4 sm:$0xff]  }
  0x75   :  { %2067 = vmatprep.subr.bf16.mxu0 %v3069_v63  ;;  %v3155_v63 = vld [vmem:[%s4405_s1 + $0x6b0] ss:$8 sps:$4 sm:$0xff]  }
  0x77   :  { %1904 = vmatpush1.bf16.msra.mxu1 %v3064_v0  ;;  %v3160_v0 = vld [vmem:[%s4405_s1 + $0x2c4] ss:$8 sps:$4 sm:$0xff]  }
  0x78   :  { %2068 = vmatpush1.bf16.msra.mxu0 %v3067_v1  ;;  %1905 = vmatprep.subr.bf16.mxu1 %v3072_v2  ;;  %v3163_v1 = vld [vmem:[%s4405_s1 + $0x6c4] ss:$8 sps:$4 sm:$0xff]   ;;  %v3158_v2 = vld [vmem:[%s4405_s1 + $0x2c0] ss:$8 sps:$4 sm:$0xff]  }
  0x79   :  { %2069 = vmatprep.subr.bf16.mxu0 %v3075_v3  ;;  %v3161_v3 = vld [vmem:[%s4405_s1 + $0x6c0] ss:$8 sps:$4 sm:$0xff]  }
  0x7b   :  { %1906 = vmatpush1.bf16.msra.mxu1 %v3070_v4  ;;  %v3166_v4 = vld [vmem:[%s4405_s1 + $0x2d4] ss:$8 sps:$4 sm:$0xff]  }
  0x7c   :  { %2070 = vmatpush1.bf16.msra.mxu0 %v3073_v5  ;;  %1907 = vmatprep.subr.bf16.mxu1 %v3078_v6  ;;  %v3169_v5 = vld [vmem:[%s4405_s1 + $0x6d4] ss:$8 sps:$4 sm:$0xff]   ;;  %v3164_v6 = vld [vmem:[%s4405_s1 + $0x2d0] ss:$8 sps:$4 sm:$0xff]  }
  0x7d   :  { %2071 = vmatprep.subr.bf16.mxu0 %v3081_v7  ;;  %v3167_v7 = vld [vmem:[%s4405_s1 + $0x6d0] ss:$8 sps:$4 sm:$0xff]  }
  0x7f   :  { %1908 = vmatpush1.bf16.msra.mxu1 %v3076_v8  ;;  %v3172_v8 = vld [vmem:[%s4405_s1 + $0x2e4] ss:$8 sps:$4 sm:$0xff]  }
  0x80   :  { %2072 = vmatpush1.bf16.msra.mxu0 %v3079_v9  ;;  %1918 = vmatprep.subr.bf16.mxu1 %v3086_v10  ;;  %v3175_v9 = vld [vmem:[%s4405_s1 + $0x6e4] ss:$8 sps:$4 sm:$0xff]   ;;  %v3170_v10 = vld [vmem:[%s4405_s1 + $0x2e0] ss:$8 sps:$4 sm:$0xff]  }
  0x81   :  { %2082 = vmatprep.subr.bf16.mxu0 %v3091_v11  ;;  %v3173_v11 = vld [vmem:[%s4405_s1 + $0x6e0] ss:$8 sps:$4 sm:$0xff]  }
  0x82   :  { %1910 = vmatmul.mubr.bf16.vlgmr.msra.gmra.mrb[0].mxu1 %v2400_v12  ;;  %v3178_v12 = vld [vmem:[%s4405_s1 + $0x2f4] ss:$8 sps:$4 sm:$0xff]  }
  0x83   :  { %2074 = vmatmul.mubr.bf16.vlgmr.msra.gmra.mrb[0].mxu0 %v2408_v14  ;;  %1919 = vmatpush1.bf16.msra.mxu1 %v3084_v13  ;;  %v3181_v13 = vld [vmem:[%s4405_s1 + $0x6f4] ss:$8 sps:$4 sm:$0xff]   ;;  %v3176_v14 = vld [vmem:[%s4405_s1 + $0x2f0] ss:$8 sps:$4 sm:$0xff]  }
  0x84   :  { %2083 = vmatpush1.bf16.msra.mxu0 %v3089_v15  ;;  %1920 = vmatprep.subr.bf16.mxu1 %v3094_v16  ;;  %v3179_v15 = vld [vmem:[%s4405_s1 + $0x6f0] ss:$8 sps:$4 sm:$0xff]   ;;  %v3186_v16 = vld [vmem:[%s4405_s1 + $0x304] ss:$8 sps:$4 sm:$0xff]  }
  0x85   :  { %2084 = vmatprep.subr.bf16.mxu0 %v3097_v17  ;;  %1950 = vmatprep.mubr.bf16.mxu1 %v2403_v19  ;;  %v3191_v17 = vld [vmem:[%s4405_s1 + $0x704] ss:$8 sps:$4 sm:$0xff]   ;;  %v3184_v19 = vld [vmem:[%s4405_s1 + $0x300] ss:$8 sps:$4 sm:$0xff]  }
  0x86   :  { %2114 = vmatprep.mubr.bf16.mxu0 %v2411_v23  ;;  %v2410_v23 = vcombine.low %v3838_v20, %v3838_v20 }
  0x87   :  { %1921 = vmatpush1.bf16.msra.mxu1 %v3092_v21  ;;  %v3189_v21 = vld [vmem:[%s4405_s1 + $0x700] ss:$8 sps:$4 sm:$0xff]  }
  0x88   :  { %2085 = vmatpush1.bf16.msra.mxu0 %v3095_v22  ;;  %1922 = vmatprep.subr.bf16.mxu1 %v3100_v24  ;;  %v2402_v22 = vcombine.low %v3831_v18, %v3831_v18  ;;  %v4035_v24 = vld [vmem:[%s4404_s0 + $0x18] sm:$0xff] }
  0x89   :  { %2086 = vmatprep.subr.bf16.mxu0 %v3103_v25  ;;  %v4040_v25 = vld [vmem:[%s4404_s0 + $0x38] sm:$0xff]  ;;  %v2405_v20 = vcombine.high %v4035_v24, %v4035_v24 }
  0x8a   :  { %v3197_v18 = vld [vmem:[%s4405_s1 + $0x714] ss:$8 sps:$4 sm:$0xff]  }
  0x8b   :  { %1923 = vmatpush1.bf16.msra.mxu1 %v3098_v26  ;;  %v3194_v26 = vld [vmem:[%s4405_s1 + $0x314] ss:$8 sps:$4 sm:$0xff]  }
  0x8c   :  { %2087 = vmatpush1.bf16.msra.mxu0 %v3101_v27  ;;  %1924 = vmatprep.subr.bf16.mxu1 %v3106_v28  ;;  %v2413_v27 = vcombine.high %v4040_v25, %v4040_v25 }
  0x8d   :  { %2088 = vmatprep.subr.bf16.mxu0 %v3109_v29 }
  0x8f   :  { %1925 = vmatpush1.bf16.msra.mxu1 %v3104_v30 }
  0x90   :  { %2089 = vmatpush1.bf16.msra.mxu0 %v3107_v31  ;;  %1926 = vmatprep.subr.bf16.mxu1 %v3112_v32 }
  0x91   :  { %2090 = vmatprep.subr.bf16.mxu0 %v3115_v33 }
  0x93   :  { %1927 = vmatpush1.bf16.msra.mxu1 %v3110_v34 }
  0x94   :  { %2091 = vmatpush1.bf16.msra.mxu0 %v3113_v35  ;;  %1928 = vmatprep.subr.bf16.mxu1 %v3118_v36 }
  0x95   :  { %2092 = vmatprep.subr.bf16.mxu0 %v3121_v37 }
  0x97   :  { %1929 = vmatpush1.bf16.msra.mxu1 %v3116_v38 }
  0x98   :  { %2093 = vmatpush1.bf16.msra.mxu0 %v3119_v39  ;;  %1930 = vmatprep.subr.bf16.mxu1 %v3124_v40 }
  0x99   :  { %2094 = vmatprep.subr.bf16.mxu0 %v3127_v41 }
  0x9b   :  { %1931 = vmatpush1.bf16.msra.mxu1 %v3122_v42 }
  0x9c   :  { %2095 = vmatpush1.bf16.msra.mxu0 %v3125_v43  ;;  %1932 = vmatprep.subr.bf16.mxu1 %v3130_v44 }
  0x9d   :  { %2096 = vmatprep.subr.bf16.mxu0 %v3133_v45 }
  0x9f   :  { %1933 = vmatpush1.bf16.msra.mxu1 %v3128_v46 }
  0xa0   :  { %2097 = vmatpush1.bf16.msra.mxu0 %v3131_v47  ;;  %1934 = vmatprep.subr.bf16.mxu1 %v3136_v48 }
  0xa1   :  { %2098 = vmatprep.subr.bf16.mxu0 %v3139_v49 }
  0xa3   :  { %1935 = vmatpush1.bf16.msra.mxu1 %v3134_v50 }
  0xa4   :  { %2099 = vmatpush1.bf16.msra.mxu0 %v3137_v51  ;;  %1936 = vmatprep.subr.bf16.mxu1 %v3142_v52 }
  0xa5   :  { %2100 = vmatprep.subr.bf16.mxu0 %v3145_v53 }
  0xa7   :  { %1937 = vmatpush1.bf16.msra.mxu1 %v3140_v54 }
  0xa8   :  { %2101 = vmatpush1.bf16.msra.mxu0 %v3143_v55  ;;  %1938 = vmatprep.subr.bf16.mxu1 %v3148_v56 }
  0xa9   :  { %2102 = vmatprep.subr.bf16.mxu0 %v3151_v57 }
  0xab   :  { %1939 = vmatpush1.bf16.msra.mxu1 %v3146_v58 }
  0xac   :  { %2103 = vmatpush1.bf16.msra.mxu0 %v3149_v59  ;;  %1940 = vmatprep.subr.bf16.mxu1 %v3154_v60 }
  0xad   :  { %2104 = vmatprep.subr.bf16.mxu0 %v3157_v61 }
  0xaf   :  { %1941 = vmatpush1.bf16.msra.mxu1 %v3152_v62 }
  0xb0   :  { %2105 = vmatpush1.bf16.msra.mxu0 %v3155_v63  ;;  %1942 = vmatprep.subr.bf16.mxu1 %v3160_v0 }
  0xb1   :  { %2106 = vmatprep.subr.bf16.mxu0 %v3163_v1 }
  0xb3   :  { %1943 = vmatpush1.bf16.msra.mxu1 %v3158_v2 }
  0xb4   :  { %2107 = vmatpush1.bf16.msra.mxu0 %v3161_v3  ;;  %1944 = vmatprep.subr.bf16.mxu1 %v3166_v4 }
  0xb5   :  { %2108 = vmatprep.subr.bf16.mxu0 %v3169_v5 }
  0xb7   :  { %1945 = vmatpush1.bf16.msra.mxu1 %v3164_v6 }
  0xb8   :  { %2109 = vmatpush1.bf16.msra.mxu0 %v3167_v7  ;;  %1946 = vmatprep.subr.bf16.mxu1 %v3172_v8 }
  0xb9   :  { %2110 = vmatprep.subr.bf16.mxu0 %v3175_v9 }
  0xbb   :  { %1947 = vmatpush1.bf16.msra.mxu1 %v3170_v10 }
  0xbc   :  { %2111 = vmatpush1.bf16.msra.mxu0 %v3173_v11  ;;  %1948 = vmatprep.subr.bf16.mxu1 %v3178_v12 }
  0xbd   :  { %2112 = vmatprep.subr.bf16.mxu0 %v3181_v13 }
  0xbf   :  { %1949 = vmatpush1.bf16.msra.mxu1 %v3176_v14 }
  0xc0   :  { %2113 = vmatpush1.bf16.msra.mxu0 %v3179_v15  ;;  %1959 = vmatprep.subr.bf16.mxu1 %v3186_v16 }
  0xc1   :  { %2123 = vmatprep.subr.bf16.mxu0 %v3191_v17 }
  0xc2   :  { %1951 = vmatmul.mubr.bf16.vlgmr.msra.gmra.mrb[0].mxu1 %v2402_v22 }
  0xc3   :  { %2115 = vmatmul.mubr.bf16.vlgmr.msra.gmra.mrb[0].mxu0 %v2410_v23 }
  0xc4   :  { %11 = vsyncpa [#allocation3], 0  ;;  %1960 = vmatpush1.bf16.msra.mxu1 %v3184_v19  ;;  %2124 = vmatpush1.bf16.msra.mxu0 %v3189_v21  ;;  %v3192_v28 = vld [vmem:[%s4405_s1 + $0x310] ss:$8 sps:$4 sm:$0xff]   ;;  %v3200_v30 = vld [vmem:[%s4405_s1 + $0x324] ss:$8 sps:$4 sm:$0xff]  }
  0xc5   :  { %v3195_v29 = vld [vmem:[%s4405_s1 + $0x710] ss:$8 sps:$4 sm:$0xff]   ;;  %1961 = vmatprep.subr.bf16.mxu1 %v3194_v26  ;;  %2125 = vmatprep.subr.bf16.mxu0 %v3197_v18  ;;  %v3203_v31 = vld [vmem:[%s4405_s1 + $0x724] ss:$8 sps:$4 sm:$0xff]   ;;  %v3198_v32 = vld [vmem:[%s4405_s1 + $0x320] ss:$8 sps:$4 sm:$0xff]  }
  0xc6   :  { %1991 = vmatprep.mubr.bf16.mxu1 %v2405_v20  ;;  %2155 = vmatprep.mubr.bf16.mxu0 %v2413_v27  ;;  %v3201_v33 = vld [vmem:[%s4405_s1 + $0x720] ss:$8 sps:$4 sm:$0xff]   ;;  %v3206_v34 = vld [vmem:[%s4405_s1 + $0x334] ss:$8 sps:$4 sm:$0xff]   ;;  %v3204_v36 = vld [vmem:[%s4405_s1 + $0x330] ss:$8 sps:$4 sm:$0xff]   ;;  %v2404_v20 = vcombine.low %v4035_v24, %v4035_v24  ;;  %v2412_v27 = vcombine.low %v4040_v25, %v4040_v25 }
  0xc7   :  { %v3209_v35 = vld [vmem:[%s4405_s1 + $0x734] ss:$8 sps:$4 sm:$0xff]   ;;  %v3207_v37 = vld [vmem:[%s4405_s1 + $0x730] ss:$8 sps:$4 sm:$0xff]   ;;  %v3212_v38 = vld [vmem:[%s4405_s1 + $0x344] ss:$8 sps:$4 sm:$0xff]  }
  0xc8   :  { %1962 = vmatpush1.bf16.msra.mxu1 %v3192_v28  ;;  %2126 = vmatpush1.bf16.msra.mxu0 %v3195_v29  ;;  %v3215_v39 = vld [vmem:[%s4405_s1 + $0x744] ss:$8 sps:$4 sm:$0xff]   ;;  %v3210_v40 = vld [vmem:[%s4405_s1 + $0x340] ss:$8 sps:$4 sm:$0xff]   ;;  %v3218_v42 = vld [vmem:[%s4405_s1 + $0x354] ss:$8 sps:$4 sm:$0xff]  }
  0xc9   :  { %1963 = vmatprep.subr.bf16.mxu1 %v3200_v30  ;;  %2127 = vmatprep.subr.bf16.mxu0 %v3203_v31  ;;  %v3213_v41 = vld [vmem:[%s4405_s1 + $0x740] ss:$8 sps:$4 sm:$0xff]   ;;  %v3221_v43 = vld [vmem:[%s4405_s1 + $0x754] ss:$8 sps:$4 sm:$0xff]   ;;  %v3216_v44 = vld [vmem:[%s4405_s1 + $0x350] ss:$8 sps:$4 sm:$0xff]  }
  0xca   :  { %v3219_v45 = vld [vmem:[%s4405_s1 + $0x750] ss:$8 sps:$4 sm:$0xff]   ;;  %v3224_v46 = vld [vmem:[%s4405_s1 + $0x364] ss:$8 sps:$4 sm:$0xff]   ;;  %v3222_v48 = vld [vmem:[%s4405_s1 + $0x360] ss:$8 sps:$4 sm:$0xff]  }
  0xcb   :  { %v3227_v47 = vld [vmem:[%s4405_s1 + $0x764] ss:$8 sps:$4 sm:$0xff]   ;;  %v3225_v49 = vld [vmem:[%s4405_s1 + $0x760] ss:$8 sps:$4 sm:$0xff]   ;;  %v3230_v50 = vld [vmem:[%s4405_s1 + $0x374] ss:$8 sps:$4 sm:$0xff]  }
  0xcc   :  { %1964 = vmatpush1.bf16.msra.mxu1 %v3198_v32  ;;  %2128 = vmatpush1.bf16.msra.mxu0 %v3201_v33  ;;  %v3233_v51 = vld [vmem:[%s4405_s1 + $0x774] ss:$8 sps:$4 sm:$0xff]   ;;  %v3228_v52 = vld [vmem:[%s4405_s1 + $0x370] ss:$8 sps:$4 sm:$0xff]   ;;  %v3236_v54 = vld [vmem:[%s4405_s1 + $0x384] ss:$8 sps:$4 sm:$0xff]  }
  0xcd   :  { %1965 = vmatprep.subr.bf16.mxu1 %v3206_v34  ;;  %2129 = vmatprep.subr.bf16.mxu0 %v3209_v35  ;;  %v3231_v53 = vld [vmem:[%s4405_s1 + $0x770] ss:$8 sps:$4 sm:$0xff]   ;;  %v3239_v55 = vld [vmem:[%s4405_s1 + $0x784] ss:$8 sps:$4 sm:$0xff]   ;;  %v3234_v56 = vld [vmem:[%s4405_s1 + $0x380] ss:$8 sps:$4 sm:$0xff]  }
  0xce   :  { %v3237_v57 = vld [vmem:[%s4405_s1 + $0x780] ss:$8 sps:$4 sm:$0xff]   ;;  %v3242_v58 = vld [vmem:[%s4405_s1 + $0x394] ss:$8 sps:$4 sm:$0xff]   ;;  %v3240_v60 = vld [vmem:[%s4405_s1 + $0x390] ss:$8 sps:$4 sm:$0xff]  }
  0xcf   :  { %v3245_v59 = vld [vmem:[%s4405_s1 + $0x794] ss:$8 sps:$4 sm:$0xff]   ;;  %v3243_v61 = vld [vmem:[%s4405_s1 + $0x790] ss:$8 sps:$4 sm:$0xff]   ;;  %v3248_v62 = vld [vmem:[%s4405_s1 + $0x3a4] ss:$8 sps:$4 sm:$0xff]  }
  0xd0   :  { %1966 = vmatpush1.bf16.msra.mxu1 %v3204_v36  ;;  %2130 = vmatpush1.bf16.msra.mxu0 %v3207_v37  ;;  %v3251_v63 = vld [vmem:[%s4405_s1 + $0x7a4] ss:$8 sps:$4 sm:$0xff]   ;;  %v3246_v0 = vld [vmem:[%s4405_s1 + $0x3a0] ss:$8 sps:$4 sm:$0xff]   ;;  %v3254_v2 = vld [vmem:[%s4405_s1 + $0x3b4] ss:$8 sps:$4 sm:$0xff]  }
  0xd1   :  { %1967 = vmatprep.subr.bf16.mxu1 %v3212_v38  ;;  %2131 = vmatprep.subr.bf16.mxu0 %v3215_v39  ;;  %v3249_v1 = vld [vmem:[%s4405_s1 + $0x7a0] ss:$8 sps:$4 sm:$0xff]   ;;  %v3257_v3 = vld [vmem:[%s4405_s1 + $0x7b4] ss:$8 sps:$4 sm:$0xff]   ;;  %v3252_v4 = vld [vmem:[%s4405_s1 + $0x3b0] ss:$8 sps:$4 sm:$0xff]  }
  0xd2   :  { %v3255_v5 = vld [vmem:[%s4405_s1 + $0x7b0] ss:$8 sps:$4 sm:$0xff]   ;;  %v3260_v6 = vld [vmem:[%s4405_s1 + $0x3c4] ss:$8 sps:$4 sm:$0xff]   ;;  %v3258_v8 = vld [vmem:[%s4405_s1 + $0x3c0] ss:$8 sps:$4 sm:$0xff]  }
  0xd3   :  { %v3263_v7 = vld [vmem:[%s4405_s1 + $0x7c4] ss:$8 sps:$4 sm:$0xff]   ;;  %v3261_v9 = vld [vmem:[%s4405_s1 + $0x7c0] ss:$8 sps:$4 sm:$0xff]   ;;  %v3266_v10 = vld [vmem:[%s4405_s1 + $0x3d4] ss:$8 sps:$4 sm:$0xff]  }
  0xd4   :  { %1968 = vmatpush1.bf16.msra.mxu1 %v3210_v40  ;;  %2132 = vmatpush1.bf16.msra.mxu0 %v3213_v41  ;;  %v3269_v11 = vld [vmem:[%s4405_s1 + $0x7d4] ss:$8 sps:$4 sm:$0xff]   ;;  %v3264_v12 = vld [vmem:[%s4405_s1 + $0x3d0] ss:$8 sps:$4 sm:$0xff]   ;;  %v3272_v14 = vld [vmem:[%s4405_s1 + $0x3e4] ss:$8 sps:$4 sm:$0xff]  }
  0xd5   :  { %1969 = vmatprep.subr.bf16.mxu1 %v3218_v42  ;;  %2133 = vmatprep.subr.bf16.mxu0 %v3221_v43  ;;  %v3267_v13 = vld [vmem:[%s4405_s1 + $0x7d0] ss:$8 sps:$4 sm:$0xff]   ;;  %v3275_v15 = vld [vmem:[%s4405_s1 + $0x7e4] ss:$8 sps:$4 sm:$0xff]   ;;  %v3270_v16 = vld [vmem:[%s4405_s1 + $0x3e0] ss:$8 sps:$4 sm:$0xff]  }
  0xd6   :  { %v3273_v17 = vld [vmem:[%s4405_s1 + $0x7e0] ss:$8 sps:$4 sm:$0xff]   ;;  %v3278_v19 = vld [vmem:[%s4405_s1 + $0x3f4] ss:$8 sps:$4 sm:$0xff]   ;;  %v3276_v22 = vld [vmem:[%s4405_s1 + $0x3f0] ss:$8 sps:$4 sm:$0xff]  }
  0xd7   :  { %v3281_v21 = vld [vmem:[%s4405_s1 + $0x7f4] ss:$8 sps:$4 sm:$0xff]   ;;  %v3279_v23 = vld [vmem:[%s4405_s1 + $0x7f0] ss:$8 sps:$4 sm:$0xff]   ;;  %v3288_v26 = vld [vmem:[%s4405_s1 + $0x804] ss:$8 sps:$4 sm:$0xff]  }
  0xd8   :  { %1970 = vmatpush1.bf16.msra.mxu1 %v3216_v44  ;;  %2134 = vmatpush1.bf16.msra.mxu0 %v3219_v45  ;;  %v4232_v18 = vld [vmem:[%s4404_s0 + $0x40] sm:$0xff]  ;;  %v3291_v30 = vld [vmem:[%s4405_s1 + $0x814] ss:$8 sps:$4 sm:$0xff]   ;;  %v3289_v24 = vld [vmem:[%s4405_s1 + $0x810] ss:$8 sps:$4 sm:$0xff]   ;;  %s3366_s21 = smov [#allocation2]  }
  0xd9   :  { %1971 = vmatprep.subr.bf16.mxu1 %v3224_v46  ;;  %2135 = vmatprep.subr.bf16.mxu0 %v3227_v47  ;;  %v3286_v28 = vld [vmem:[%s4405_s1 + $0x800] ss:$8 sps:$4 sm:$0xff]   ;;  %v2415_v29 = vcombine.high %v4232_v18, %v4232_v18  ;;  %v3294_v25 = vld [vmem:[%s4405_s1 + $0x824] ss:$8 sps:$4 sm:$0xff]   ;;  %v3297_v32 = vld [vmem:[%s4405_s1 + $0x834] ss:$8 sps:$4 sm:$0xff]  }
  0xda   :  { %v3292_v31 = vld [vmem:[%s4405_s1 + $0x820] ss:$8 sps:$4 sm:$0xff]   ;;  %v3295_v33 = vld [vmem:[%s4405_s1 + $0x830] ss:$8 sps:$4 sm:$0xff]   ;;  %v3300_v34 = vld [vmem:[%s4405_s1 + $0x844] ss:$8 sps:$4 sm:$0xff]  }
  0xdb   :  { %v3298_v35 = vld [vmem:[%s4405_s1 + $0x840] ss:$8 sps:$4 sm:$0xff]   ;;  %v3303_v36 = vld [vmem:[%s4405_s1 + $0x854] ss:$8 sps:$4 sm:$0xff]   ;;  %v3301_v37 = vld [vmem:[%s4405_s1 + $0x850] ss:$8 sps:$4 sm:$0xff]  }
  0xdc   :  { %1972 = vmatpush1.bf16.msra.mxu1 %v3222_v48  ;;  %2136 = vmatpush1.bf16.msra.mxu0 %v3225_v49  ;;  %v3306_v38 = vld [vmem:[%s4405_s1 + $0x864] ss:$8 sps:$4 sm:$0xff]   ;;  %v3304_v39 = vld [vmem:[%s4405_s1 + $0x860] ss:$8 sps:$4 sm:$0xff]   ;;  %v3309_v40 = vld [vmem:[%s4405_s1 + $0x874] ss:$8 sps:$4 sm:$0xff]  }
  0xdd   :  { %1973 = vmatprep.subr.bf16.mxu1 %v3230_v50  ;;  %2137 = vmatprep.subr.bf16.mxu0 %v3233_v51  ;;  %v3307_v41 = vld [vmem:[%s4405_s1 + $0x870] ss:$8 sps:$4 sm:$0xff]   ;;  %v3312_v42 = vld [vmem:[%s4405_s1 + $0x884] ss:$8 sps:$4 sm:$0xff]   ;;  %v3310_v43 = vld [vmem:[%s4405_s1 + $0x880] ss:$8 sps:$4 sm:$0xff]  }
  0xde   :  { %v3315_v44 = vld [vmem:[%s4405_s1 + $0x894] ss:$8 sps:$4 sm:$0xff]   ;;  %v3313_v45 = vld [vmem:[%s4405_s1 + $0x890] ss:$8 sps:$4 sm:$0xff]   ;;  %v3318_v46 = vld [vmem:[%s4405_s1 + $0x8a4] ss:$8 sps:$4 sm:$0xff]  }
  0xdf   :  { %v3316_v47 = vld [vmem:[%s4405_s1 + $0x8a0] ss:$8 sps:$4 sm:$0xff]   ;;  %v3321_v48 = vld [vmem:[%s4405_s1 + $0x8b4] ss:$8 sps:$4 sm:$0xff]   ;;  %v3319_v49 = vld [vmem:[%s4405_s1 + $0x8b0] ss:$8 sps:$4 sm:$0xff]  }
  0xe0   :  { %1974 = vmatpush1.bf16.msra.mxu1 %v3228_v52  ;;  %2138 = vmatpush1.bf16.msra.mxu0 %v3231_v53  ;;  %v3324_v50 = vld [vmem:[%s4405_s1 + $0x8c4] ss:$8 sps:$4 sm:$0xff]   ;;  %v3322_v51 = vld [vmem:[%s4405_s1 + $0x8c0] ss:$8 sps:$4 sm:$0xff]   ;;  %v3327_v52 = vld [vmem:[%s4405_s1 + $0x8d4] ss:$8 sps:$4 sm:$0xff]  }
  0xe1   :  { %1975 = vmatprep.subr.bf16.mxu1 %v3236_v54  ;;  %2139 = vmatprep.subr.bf16.mxu0 %v3239_v55  ;;  %v3325_v53 = vld [vmem:[%s4405_s1 + $0x8d0] ss:$8 sps:$4 sm:$0xff]   ;;  %v3330_v54 = vld [vmem:[%s4405_s1 + $0x8e4] ss:$8 sps:$4 sm:$0xff]   ;;  %v3328_v55 = vld [vmem:[%s4405_s1 + $0x8e0] ss:$8 sps:$4 sm:$0xff]  }
  0xe2   :  { %s2390_s22 = sshll.u32 %s3366_s21, 4  ;;  %s2391_s22 = int_to_ptr.vmem [resolvable:$true] %s2390_s22 }
  0xe3   :  { %s3342_s23 = scalar_lea.vmem %s2391_s22, 128  ;;  %p3347_p1 = scmp.lt.s32.totalorder %s2391_s22, %s2391_s22 }
  0xe4   :  { %1976 = vmatpush1.bf16.msra.mxu1 %v3234_v56  ;;  %2140 = vmatpush1.bf16.msra.mxu0 %v3237_v57  ;;  %v3333_v56 = vld [vmem:[%s4405_s1 + $0x8f4] ss:$8 sps:$4 sm:$0xff]   ;;  %v3331_v57 = vld [vmem:[%s4405_s1 + $0x8f0] ss:$8 sps:$4 sm:$0xff]   ;;  %p3343_p0 = scmp.ne.s32.totalorder %s2391_s22, %s3342_s23  ;;  %p3348_p2 = scmp.lt.s32.totalorder %s3342_s23, %s3342_s23 }
  0xe5   :  { %1977 = vmatprep.subr.bf16.mxu1 %v3242_v58  ;;  %2141 = vmatprep.subr.bf16.mxu0 %v3245_v59  ;;  %v2414_v58 = vcombine.low %v4232_v18, %v4232_v18  ;;  %v2778_v59 = vld [vmem:[%s4407_s3 + $0x40] sm:$0xff]  }
  0xe6   :  { %p3349_p3 = por %p3348_p2, %p3347_p1 }
  0xe8   :  { %1978 = vmatpush1.bf16.msra.mxu1 %v3240_v60  ;;  %2142 = vmatpush1.bf16.msra.mxu0 %v3243_v61  ;;  %v2708_v60 = vld [vmem:[%s4407_s3] sm:$0xff]   ;;  %v2779_v61 = vld [vmem:[%s4407_s3 + $0x48] sm:$0xff]   ;;  %p3350_p4 = pnand %p3349_p3, %p3343_p0 }
  0xe9   :  { %1979 = vmatprep.subr.bf16.mxu1 %v3248_v62  ;;  %2143 = vmatprep.subr.bf16.mxu0 %v3251_v63  ;;  %v2771_v62 = vld [vmem:[%s4407_s3 + $0x8] sm:$0xff]   ;;  %v2780_v63 = vld [vmem:[%s4407_s3 + $0x50] sm:$0xff]  }
  0xec   :  { %1980 = vmatpush1.bf16.msra.mxu1 %v3246_v0  ;;  %2144 = vmatpush1.bf16.msra.mxu0 %v3249_v1  ;;  %v2772_v0 = vld [vmem:[%s4407_s3 + $0x10] sm:$0xff]   ;;  %v2781_v1 = vld [vmem:[%s4407_s3 + $0x58] sm:$0xff]  }
  0xed   :  { %1981 = vmatprep.subr.bf16.mxu1 %v3254_v2  ;;  %2145 = vmatprep.subr.bf16.mxu0 %v3257_v3  ;;  %v2773_v2 = vld [vmem:[%s4407_s3 + $0x18] sm:$0xff]   ;;  %v2782_v3 = vld [vmem:[%s4407_s3 + $0x60] sm:$0xff]  }
  0xf0   :  { %1982 = vmatpush1.bf16.msra.mxu1 %v3252_v4  ;;  %2146 = vmatpush1.bf16.msra.mxu0 %v3255_v5  ;;  %v2774_v4 = vld [vmem:[%s4407_s3 + $0x20] sm:$0xff]   ;;  %v2783_v5 = vld [vmem:[%s4407_s3 + $0x68] sm:$0xff]  }
  0xf1   :  { %1983 = vmatprep.subr.bf16.mxu1 %v3260_v6  ;;  %2147 = vmatprep.subr.bf16.mxu0 %v3263_v7  ;;  %v2775_v6 = vld [vmem:[%s4407_s3 + $0x28] sm:$0xff]   ;;  %v2784_v7 = vld [vmem:[%s4407_s3 + $0x70] sm:$0xff]  }
  0xf4   :  { %1984 = vmatpush1.bf16.msra.mxu1 %v3258_v8  ;;  %2148 = vmatpush1.bf16.msra.mxu0 %v3261_v9  ;;  %v2776_v8 = vld [vmem:[%s4407_s3 + $0x30] sm:$0xff]   ;;  %v2785_v9 = vld [vmem:[%s4407_s3 + $0x78] sm:$0xff]  }
  0xf5   :  { %1985 = vmatprep.subr.bf16.mxu1 %v3266_v10  ;;  %2149 = vmatprep.subr.bf16.mxu0 %v3269_v11  ;;  %v2777_v10 = vld [vmem:[%s4407_s3 + $0x38] sm:$0xff]  }
  0xf8   :  { %1986 = vmatpush1.bf16.msra.mxu1 %v3264_v12  ;;  %2150 = vmatpush1.bf16.msra.mxu0 %v3267_v13 }
  0xf9   :  { %1987 = vmatprep.subr.bf16.mxu1 %v3272_v14  ;;  %2151 = vmatprep.subr.bf16.mxu0 %v3275_v15  ;;  %v323_v15 = vlaneseq }
  0xfc   :  { %1988 = vmatpush1.bf16.msra.mxu1 %v3270_v16  ;;  %2152 = vmatpush1.bf16.msra.mxu0 %v3273_v17  ;;  %v324_v16 = vshrl.u32 %v323_v15, 7 }
  0xfd   :  { %1989 = vmatprep.subr.bf16.mxu1 %v3278_v19  ;;  %2153 = vmatprep.subr.bf16.mxu0 %v3281_v21  ;;  %v321_v19 = vld [vmem:[%s4406_s2] sm:$0x3] }
  0xfe   :  { %v325_v17 = vsub.s32 0, %v324_v16  ;;  %v329_v21 = vsub.s32 1, %v324_v16 }
 0x100   :  { %1990 = vmatpush1.bf16.msra.mxu1 %v3276_v22  ;;  %2154 = vmatpush1.bf16.msra.mxu0 %v3279_v23  ;;  %v326_v22 = vrot.slane %v321_v19, %v325_v17  ;;  %v330_v23 = vrot.slane %v321_v19, %v329_v21 }
 0x101   :  { %2164 = vmatprep.subr.bf16.mxu0 %v3288_v26  ;;  %2822 = vmatprep.subr.bf16.mxu1 %v2778_v59 }
 0x103   :  { %1992 = vmatmul.mubr.bf16.vlgmr.msra.gmra.mrb[0].mxu1 %v2404_v20  ;;  %2156 = vmatmul.mubr.bf16.vlgmr.msra.gmra.mrb[0].mxu0 %v2412_v27 }
 0x104   :  { %2165 = vmatpush1.bf16.msra.mxu0 %v3286_v28  ;;  %2196 = vmatprep.mubr.bf16.mxu0 %v2415_v29 }
 0x105   :  { %2166 = vmatprep.subr.bf16.mxu0 %v3291_v30  ;;  %2824 = vmatpush3.bf16.msra.mxu1 %v2708_v60 }
 0x106   :  { %2826 = vmatprep.subr.bf16.mxu1 %v2779_v61 }
 0x108   :  { %2167 = vmatpush1.bf16.msra.mxu0 %v3289_v24 }
 0x109   :  { %2168 = vmatprep.subr.bf16.mxu0 %v3294_v25  ;;  %2828 = vmatpush3.bf16.msra.mxu1 %v2771_v62 }
 0x10a   :  { %2830 = vmatprep.subr.bf16.mxu1 %v2780_v63 }
 0x10c   :  { %2169 = vmatpush1.bf16.msra.mxu0 %v3292_v31 }
 0x10d   :  { %2170 = vmatprep.subr.bf16.mxu0 %v3297_v32  ;;  %2832 = vmatpush3.bf16.msra.mxu1 %v2772_v0 }
 0x10e   :  { %2834 = vmatprep.subr.bf16.mxu1 %v2781_v1 }
 0x110   :  { %2171 = vmatpush1.bf16.msra.mxu0 %v3295_v33 }
 0x111   :  { %2172 = vmatprep.subr.bf16.mxu0 %v3300_v34  ;;  %2836 = vmatpush3.bf16.msra.mxu1 %v2773_v2 }
 0x112   :  { %2838 = vmatprep.subr.bf16.mxu1 %v2782_v3 }
 0x114   :  { %2173 = vmatpush1.bf16.msra.mxu0 %v3298_v35 }
 0x115   :  { %2174 = vmatprep.subr.bf16.mxu0 %v3303_v36  ;;  %2840 = vmatpush3.bf16.msra.mxu1 %v2774_v4 }
 0x116   :  { %2842 = vmatprep.subr.bf16.mxu1 %v2783_v5 }
 0x118   :  { %2175 = vmatpush1.bf16.msra.mxu0 %v3301_v37 }
 0x119   :  { %2176 = vmatprep.subr.bf16.mxu0 %v3306_v38  ;;  %2844 = vmatpush3.bf16.msra.mxu1 %v2775_v6 }
 0x11a   :  { %2846 = vmatprep.subr.bf16.mxu1 %v2784_v7 }
 0x11c   :  { %2177 = vmatpush1.bf16.msra.mxu0 %v3304_v39 }
 0x11d   :  { %2178 = vmatprep.subr.bf16.mxu0 %v3309_v40  ;;  %2848 = vmatpush3.bf16.msra.mxu1 %v2776_v8 }
 0x11e   :  { %2850 = vmatprep.subr.bf16.mxu1 %v2785_v9 }
 0x120   :  { %2179 = vmatpush1.bf16.msra.mxu0 %v3307_v41 }
 0x121   :  { %2180 = vmatprep.subr.bf16.mxu0 %v3312_v42  ;;  %2852 = vmatpush3.bf16.msra.mxu1 %v2777_v10 }
 0x124   :  { %2181 = vmatpush1.bf16.msra.mxu0 %v3310_v43 }
 0x125   :  { %2182 = vmatprep.subr.bf16.mxu0 %v3315_v44 }
 0x128   :  { %2183 = vmatpush1.bf16.msra.mxu0 %v3313_v45 }
 0x129   :  { %2184 = vmatprep.subr.bf16.mxu0 %v3318_v46 }
 0x12c   :  { %2185 = vmatpush1.bf16.msra.mxu0 %v3316_v47 }
 0x12d   :  { %2186 = vmatprep.subr.bf16.mxu0 %v3321_v48 }
 0x130   :  { %2187 = vmatpush1.bf16.msra.mxu0 %v3319_v49 }
 0x131   :  { %2188 = vmatprep.subr.bf16.mxu0 %v3324_v50 }
 0x134   :  { %2189 = vmatpush1.bf16.msra.mxu0 %v3322_v51 }
 0x135   :  { %2190 = vmatprep.subr.bf16.mxu0 %v3327_v52 }
 0x138   :  { %2191 = vmatpush1.bf16.msra.mxu0 %v3325_v53  ;;  %v2704_v53 = vld [vmem:[%s4408_s4] ss:$0 sm:$0xff] }
 0x139   :  { %2192 = vmatprep.subr.bf16.mxu0 %v3330_v54 }
 0x13c   :  { %2193 = vmatpush1.bf16.msra.mxu0 %v3328_v55  ;;  %v2705_v55 = vld [vmem:[%s4409_s5] ss:$0 sm:$0xff] }
 0x13d   :  { %2194 = vmatprep.subr.bf16.mxu0 %v3333_v56 }
 0x140   :  { %2195 = vmatpush1.bf16.msra.mxu0 %v3331_v57 }
 0x143   :  { %2197 = vmatmul.mubr.bf16.vlgmr.msra.gmra.mrb[0].mxu0 %v2414_v58 }
 0x1d6   :  { %v1993_v11 = vpop.f32.mrb[0].mxu1 }
 0x1d7   :  { %v1995_v12 = vpop.f32.mrb[1].mxu1  ;;  %v2853_v26 = vadd.f32 %v1993_v11, %v326_v22 }
 0x1d8   :  { %v1997_v13 = vpop.f32.mrb[2].mxu1  ;;  %v2855_v18 = vadd.f32 %v1995_v12, %v330_v23 }
 0x1d9   :  { %v1998_v14 = vpop.f32.mrb[3].mxu1 }
 0x216   :  { %v2198_v20 = vpop.f32.mrb[0].mxu0 }
 0x217   :  { %v2854_v27 = vadd.f32 %v2853_v26, %v2198_v20  ;;  %v2200_v28 = vpop.f32.mrb[1].mxu0 }
 0x218   :  { %v2856_v29 = vadd.f32 %v2855_v18, %v2200_v28  ;;  %v2202_v30 = vpop.f32.mrb[2].mxu0 }
 0x219   :  { %v2203_v24 = vpop.f32.mrb[3].mxu0  ;;  %v2205_v31 = vmax.f32 %v2854_v27, 0.0 }
 0x21a   :  { %v2206_v25 = vmax.f32 %v2856_v29, 0.0 }
 0x21c   :  { %2335 = vmatprep.mubr.f32.mxu1 %v2206_v25 }
 0x21d   :  { %2336 = vmatmul.mubr.f32.vlgmr.msra.gmra.mrb[4].mxu1 %v2205_v31 }
 0x2f0   :  { %v2818_v32 = vpop.f32.mrb[4].mxu1 }
 0x2f1   :  { %v2819_v33 = vpop.f32.mrb[5].mxu1 }
 0x2f2   :  { %v2820_v34 = vadd.f32 %v2819_v33, %v2818_v32 }
 0x2f4   :  { %v2341_v35 = vrot.slane %v2820_v34, 4 }
 0x2f6   :  { %v2342_v36 = vadd.f32 %v2820_v34, %v2341_v35 }
 0x2f8   :  { %v2343_v37 = vrot.slane %v2342_v36, 2 }
 0x2fa   :  { %v2344_v38 = vadd.f32 %v2343_v37, %v2342_v36 }
 0x2fc   :  { %v2345_v39 = vrot.slane %v2344_v38, 1 }
 0x2fe   :  { %v2346_v40 = vadd.f32 %v2345_v39, %v2344_v38 }
 0x300   :  { %v2348_v41 = vmul.f32 0.125, %v2346_v40 }
 0x302   :  { %v2349_v42 = vsub.f32 %v2820_v34, %v2348_v41 }
 0x304   :  { %v2350_v43 = vmul.f32 %v2349_v42, %v2349_v42 }
 0x306   :  { %v2351_v44 = vrot.slane %v2350_v43, 4 }
 0x308   :  { %v2352_v45 = vadd.f32 %v2351_v44, %v2350_v43 }
 0x30a   :  { %v2353_v46 = vrot.slane %v2352_v45, 2 }
 0x30c   :  { %v2354_v47 = vadd.f32 %v2353_v46, %v2352_v45 }
 0x30e   :  { %v2355_v48 = vrot.slane %v2354_v47, 1 }
 0x310   :  { %v2356_v49 = vadd.f32 %v2355_v48, %v2354_v47 }
 0x312   :  { %v2357_v50 = vmul.f32 0.125, %v2356_v49 }
 0x314   :  { %v2359_v51 = vadd.f32 1e-05, %v2357_v50 }
 0x316   :  { %3336 = vrsqrt.f32 %v2359_v51 }
 0x320   :  { %v3337_v52 = vpop.eup %3336 }
 0x321   :  { %v2361_v54 = vmul.f32 %v3337_v52, %v2349_v42 }
 0x323   :  { %v2368_v56 = vmul.f32 %v2704_v53, %v2361_v54 }
 0x325   :  { %v2376_v57 = vadd.f32 %v2705_v55, %v2368_v56 }
 0x327   :  { %v2706_v58 = vmul.f32 -1.442695, %v2376_v57 }
 0x329   :  { %3338 = vpow2.f32 %v2706_v58 }
 0x333   :  { %v3339_v59 = vpop.eup %3338 }
 0x334   :  { %v2380_v60 = vadd.f32 1.0, %v3339_v59 }
 0x336   :  { %3340 = vrcp.f32 %v2380_v60 }
 0x340   :  { %v3341_v61 = vpop.eup %3340 }
 0x341   :  { %2383 = vst [vmem:[#allocation2] sm:$0xff] %v3341_v61 }
 0x342   :  { %3353 = shalt.err (!%p3350_p4)
}
 0x343   :  { %s3354_s24 = scalar_lea.hbm %s4410_s6, 128 }
 0x344   :  { %p3355_p5 = scmp.ne.s32.totalorder %s4410_s6, %s3354_s24  ;;  %p3358_p6 = scmp.lt.u32.totalorder %s3354_s24, %s4410_s6 }
 0x346   :  { %p3360_p7 = pnand %p3358_p6, %p3355_p5 }
 0x348   :  { %3363 = shalt.err (!%p3360_p7)
}
 0x349   :  { %2393 = dma.vmem_to_hbm [thread:$0]  %s2391_s22, 128, %s4410_s6, [#allocation3]  }
 0x34a   :  { %3364 = dma.done.wait [#allocation3], 128  }
 0x34b   :  { %3365 = vsyncadd [#allocation3], 4294967168 }
 0x34c   :  { %2397 = vsyncpa [#allocation3], 1 }

</bundles_post_ra>
